<compile_context>
chip_gen: v5e
topology: v5e:2x2
jax: 0.10.0
libtpu: 0.0.40
codegen_flags: <defaults>
</compile_context>

<pallas_src>
import functools
import math

import jax
import jax.numpy as jnp
from jax.experimental import pallas as pl
from jax.experimental.pallas import tpu as pltpu

# ----------------------- synthetic config (small) -----------------------
VOCAB = 64
EMBED = 32
N_LAYERS = 2
N_HEADS = 4
QK_NOPE = 8            # non-rotary part of q/k head dim
QK_ROPE = 8            # rotary (decoupled) part of q/k head dim
V_HEAD = 8             # value head dim
KV_LORA = 16           # compressed kv latent rank (kv_cache width)
MLP_HIDDEN = 4 * EMBED
RMS_EPS = 1.1920928955078125e-07   # torch.finfo(float32).eps (nn.RMSNorm default)

DQK = QK_NOPE + QK_ROPE            # per-head q/k dim (16)
DQ_NOPE = N_HEADS * QK_NOPE        # 32
DQ_ROPE = N_HEADS * QK_ROPE        # 32
DKV_ALL = N_HEADS * (QK_NOPE + V_HEAD)   # 64 : [k_nope all heads | v all heads]
C_KV_OFF = DQ_NOPE + DQ_ROPE       # 64
K_R_OFF = C_KV_OFF + KV_LORA       # 80
PROJ_W = K_R_OFF + QK_ROPE         # 88 : real fused-projection width
PROJ_PAD = 128                     # padded to one full lane tile / MXU column tile


# --------------------------- in-kernel helpers ---------------------------
def _rms(x, w):
    ms = jnp.mean(x * x, axis=-1, keepdims=True)
    return x * jax.lax.rsqrt(ms + RMS_EPS) * w


def _bf16_dot(a, b):
    """MXU matmul: bf16 operands, f32 accumulation (v5e/v6e/v7x friendly)."""
    return jnp.dot(a.astype(jnp.bfloat16), b.astype(jnp.bfloat16),
                   preferred_element_type=jnp.float32)


# ----------------------------- fused kernel -----------------------------
def _fused_forward_kernel(
        x_in_ref, cos_ref, sin_a_ref, sin_b_ref,
        attn_norm_ref, w_qkr_ref, b_qkr_ref,
        w_ukv_ref, b_ukv_ref, w_o_ref, b_o_ref,
        mlp_norm_ref, w1_ref, b1_ref, w2_ref, b2_ref,
        final_norm_ref, head_w_ref,
        *rest, B, S, T_PAST, scale):
    """One grid step == one transformer layer (plus final head on last step)."""
    if T_PAST > 0:
        (past_kv_ref, past_kr_ref,
         kv_out_ref, kr_out_ref, logits_ref, x_sc, attn_sc) = rest
    else:
        past_kv_ref = past_kr_ref = None
        kv_out_ref, kr_out_ref, logits_ref, x_sc, attn_sc = rest

    layer = pl.program_id(0)
    bf = jnp.bfloat16

    @pl.when(layer == 0)
    def _():
        x_sc[...] = x_in_ref[...]

    x = x_sc[...]                                          # (M, EMBED) f32

    # ---- attention sub-block: RMSNorm + fused [q_nope|q_rope|c_kv|k_r] proj
    h = _rms(x, attn_norm_ref[...])
    proj = _bf16_dot(h, w_qkr_ref[...]) + b_qkr_ref[...]   # (M, 128) f32

    # rotate-half RoPE on the whole lane-dense slab: the two XLU rolls fetch
    # each rope column's "partner" (+half / -half inside its 8-wide block);
    # cos/sin tables are 1/0 outside rope columns so q_nope / c_kv / padding
    # pass through untouched.
    half = QK_ROPE // 2
    proj = (proj * cos_ref[...]
            + pltpu.roll(proj, PROJ_PAD - half, 1) * sin_a_ref[...]
            + pltpu.roll(proj, half, 1) * sin_b_ref[...])

    q_nope = proj[:, :DQ_NOPE]                             # (M, 32)
    q_rope = proj[:, DQ_NOPE:DQ_NOPE + DQ_ROPE]            # (M, 32)
    c_kv = proj[:, C_KV_OFF:C_KV_OFF + KV_LORA]            # (M, 16)
    k_r = proj[:, K_R_OFF:K_R_OFF + QK_ROPE]               # (M, 8)

    # per-layer cache outputs (narrow by API contract)
    kv_out_ref[...] = c_kv.astype(kv_out_ref.dtype)
    kr_out_ref[...] = k_r.astype(kr_out_ref.dtype)

    # ---- kv up-projection: one matmul for all current rows; hoisted bf16 casts
    # TODO(synk): for decode, MLA weight absorption (fold W_uk into q and W_uv
    # into w_o) would avoid re-up-projecting the past latent every step.
    w_ukv_bf = w_ukv_ref[...].astype(bf)
    b_ukv = b_ukv_ref[...]
    kv_new = jnp.dot(c_kv.astype(bf), w_ukv_bf,
                     preferred_element_type=jnp.float32) + b_ukv   # (M, 64)
    kv_new_bf = kv_new.astype(bf)
    kr_new_bf = k_r.astype(bf)
    q_nope_bf = q_nope.astype(bf)
    q_rope_bf = q_rope.astype(bf)
    w_o_bf = w_o_ref[...].astype(bf)

    if T_PAST > 0:
        kv_past = jnp.dot(past_kv_ref[...].astype(bf), w_ukv_bf,
                          preferred_element_type=jnp.float32) + b_ukv
        kv_past_bf = kv_past.astype(bf)                    # (B*T_PAST, 64)
        kr_past_bf = past_kr_ref[...].astype(bf)           # (B*T_PAST, 8)

    # causal mask only applies among the new tokens; past tokens are all visible
    row = jax.lax.broadcasted_iota(jnp.int32, (S, S), 0)
    col = jax.lax.broadcasted_iota(jnp.int32, (S, S), 1)
    causal = col <= row
    neg = jnp.float32(-1e30)                # finite: safe even for masked rows
    dims = (((1,), (1,)), ((), ()))         # q @ k^T (contract minor dims)

    # TODO(synk): for larger B, lift the batch loop onto a "parallel" grid axis
    # (v7x megacore) instead of a static Python unroll.
    for b in range(B):
        qn_b = q_nope_bf[b * S:(b + 1) * S, :]
        qr_b = q_rope_bf[b * S:(b + 1) * S, :]
        kvn_b = kv_new_bf[b * S:(b + 1) * S, :]
        krn_b = kr_new_bf[b * S:(b + 1) * S, :]
        if T_PAST > 0:
            kvp_b = kv_past_bf[b * T_PAST:(b + 1) * T_PAST, :]
            krp_b = kr_past_bf[b * T_PAST:(b + 1) * T_PAST, :]
        out_b = jnp.zeros((S, EMBED), jnp.float32)
        for hh in range(N_HEADS):
            qn = qn_b[:, hh * QK_NOPE:(hh + 1) * QK_NOPE]
            qr = qr_b[:, hh * QK_ROPE:(hh + 1) * QK_ROPE]
            kn = kvn_b[:, hh * QK_NOPE:(hh + 1) * QK_NOPE]
            vn = kvn_b[:, DQ_NOPE + hh * V_HEAD:DQ_NOPE + (hh + 1) * V_HEAD]
            # split scores (nope + rope terms) -> no k concat needed
            s_new = (jax.lax.dot_general(qn, kn, dims,
                                         preferred_element_type=jnp.float32)
                     + jax.lax.dot_general(qr, krn_b, dims,
                                           preferred_element_type=jnp.float32)
                     ) * scale
            s_new = jnp.where(causal, s_new, neg)
            m = jnp.max(s_new, axis=-1, keepdims=True)
            if T_PAST > 0:
                kp = kvp_b[:, hh * QK_NOPE:(hh + 1) * QK_NOPE]
                vp = kvp_b[:, DQ_NOPE + hh * V_HEAD:DQ_NOPE + (hh + 1) * V_HEAD]
                s_past = (jax.lax.dot_general(qn, kp, dims,
                                              preferred_element_type=jnp.float32)
                          + jax.lax.dot_general(qr, krp_b, dims,
                                                preferred_element_type=jnp.float32)
                          ) * scale
                m = jnp.maximum(m, jnp.max(s_past, axis=-1, keepdims=True))
            p_new = jnp.exp(s_new - m)
            denom = jnp.sum(p_new, axis=-1, keepdims=True)
            o_h = jnp.dot(p_new.astype(bf), vn,
                          preferred_element_type=jnp.float32)
            if T_PAST > 0:
                p_past = jnp.exp(s_past - m)
                denom = denom + jnp.sum(p_past, axis=-1, keepdims=True)
                o_h = o_h + jnp.dot(p_past.astype(bf), vp,
                                    preferred_element_type=jnp.float32)
            o_h = o_h / denom                               # exact f32 divide
            # accumulate per-head output projection (no head concat)
            out_b = out_b + jnp.dot(o_h.astype(bf),
                                    w_o_bf[hh * V_HEAD:(hh + 1) * V_HEAD, :],
                                    preferred_element_type=jnp.float32)
        attn_sc[b * S:(b + 1) * S, :] = out_b               # scratch slab store

    x = x + attn_sc[...] + b_o_ref[...]

    # ---- MLP sub-block (pre-RMSNorm + GELU), residual
    hm = _rms(x, mlp_norm_ref[...])
    # TODO(synk): PyTorch nn.GELU defaults to exact erf; tanh approximation is
    # used here because it maps onto the EUP.
    hm = jax.nn.gelu(_bf16_dot(hm, w1_ref[...]) + b1_ref[...], approximate=True)
    x = x + _bf16_dot(hm, w2_ref[...]) + b2_ref[...]
    x_sc[...] = x

    # ---- final RMSNorm + LM head, fused into the last grid step
    @pl.when(layer == pl.num_programs(0) - 1)
    def _():
        hf = _rms(x, final_norm_ref[...])
        logits_ref[...] = _bf16_dot(hf, head_w_ref[...]).astype(logits_ref.dtype)


# ----------------------------- BlockSpec helpers -----------------------------
def _fixed(shape):
    """Whole-array block, identical for every grid step."""
    return pl.BlockSpec(tuple(shape), lambda l, _n=len(shape): (0,) * _n)


def _per_layer(shape):
    """Select layer `l` from an (N_LAYERS, ...) stacked array (leading dim squeezed)."""
    ndim = len(shape) - 1
    return pl.BlockSpec((None,) + tuple(shape[1:]),
                        lambda l, _n=ndim: (l,) + (0,) * _n)


# ----------------------------- pallas_call wrapper -----------------------------
def _fused_call(x2, tables, p, past_kv, past_kr, *, B, S, T_PAST):
    M = B * S
    scale = 1.0 / math.sqrt(DQK)
    kernel = functools.partial(_fused_forward_kernel,
                               B=B, S=S, T_PAST=T_PAST, scale=scale)

    in_specs = [
        _fixed((M, EMBED)),
        _fixed((M, PROJ_PAD)), _fixed((M, PROJ_PAD)), _fixed((M, PROJ_PAD)),
        _per_layer(p["attn_norm_w"].shape),
        _per_layer(p["w_qkr"].shape), _per_layer(p["b_qkr"].shape),
        _per_layer(p["w_ukv"].shape), _per_layer(p["b_ukv"].shape),
        _per_layer(p["w_o"].shape), _per_layer(p["b_o"].shape),
        _per_layer(p["mlp_norm_w"].shape),
        _per_layer(p["w_mlp1"].shape), _per_layer(p["b_mlp1"].shape),
        _per_layer(p["w_mlp2"].shape), _per_layer(p["b_mlp2"].shape),
        _fixed((1, EMBED)), _fixed((EMBED, VOCAB)),
    ]
    args = [x2, *tables,
            p["attn_norm_w"], p["w_qkr"], p["b_qkr"],
            p["w_ukv"], p["b_ukv"], p["w_o"], p["b_o"],
            p["mlp_norm_w"], p["w_mlp1"], p["b_mlp1"],
            p["w_mlp2"], p["b_mlp2"],
            p["norm_w"], p["head_w"]]
    if T_PAST > 0:
        in_specs += [_per_layer(past_kv.shape), _per_layer(past_kr.shape)]
        args += [past_kv, past_kr]

    out_specs = [
        _per_layer((N_LAYERS, M, KV_LORA)),
        _per_layer((N_LAYERS, M, QK_ROPE)),
        _fixed((M, VOCAB)),
    ]
    out_shape = (
        jax.ShapeDtypeStruct((N_LAYERS, M, KV_LORA), jnp.float32),
        jax.ShapeDtypeStruct((N_LAYERS, M, QK_ROPE), jnp.float32),
        jax.ShapeDtypeStruct((M, VOCAB), jnp.float32),
    )
    return pl.pallas_call(
        kernel,
        grid=(N_LAYERS,),
        in_specs=in_specs,
        out_specs=out_specs,
        out_shape=out_shape,
        scratch_shapes=[pltpu.VMEM((M, EMBED), jnp.float32),   # residual stream
                        pltpu.VMEM((M, EMBED), jnp.float32)],  # attention slab
        compiler_params=pltpu.CompilerParams(
            # the layer axis is a sequential dependency chain; at larger sizes a
            # leading batch/row axis marked "parallel" would feed v7x's 2nd core.
            dimension_semantics=("arbitrary",)),
    )(*args)


# ----------------------------- JAX glue -----------------------------
def _rope_tables(past, S, B):
    """Lane-dense (M, 128) cos / sin-mask tables matching the padded proj layout."""
    half = QK_ROPE // 2
    inv_freq = 1.0 / (10000.0 ** (jnp.arange(half, dtype=jnp.float32) / half))
    pos = jnp.arange(past, past + S, dtype=jnp.float32)
    ang = pos[:, None] * inv_freq[None, :]                  # (S, half)
    cos, sin = jnp.cos(ang), jnp.sin(ang)
    zero = jnp.zeros_like(cos)
    cos8 = jnp.concatenate([cos, cos], axis=-1)             # (S, 8)
    sa8 = jnp.concatenate([-sin, zero], axis=-1)            # pairs with roll(-half)
    sb8 = jnp.concatenate([zero, sin], axis=-1)             # pairs with roll(+half)

    def slab(rope8, fill):
        fcol = jnp.full((S, 1), fill, jnp.float32)
        return jnp.concatenate([
            jnp.broadcast_to(fcol, (S, DQ_NOPE)),            # q_nope: pass-through
            jnp.tile(rope8, (1, N_HEADS)),                   # q_rope blocks
            jnp.broadcast_to(fcol, (S, KV_LORA)),            # c_kv: pass-through
            rope8,                                           # k_r block
            jnp.broadcast_to(fcol, (S, PROJ_PAD - PROJ_W)),  # padding
        ], axis=-1)

    def bcast(t):   # rows are (b, s) b-major, same table for every batch
        return jnp.broadcast_to(t[None], (B, S, PROJ_PAD)).reshape(B * S, PROJ_PAD)

    return bcast(slab(cos8, 1.0)), bcast(slab(sa8, 0.0)), bcast(slab(sb8, 0.0))


def transformer_forward(params, input_ids, kv_caches=None, kr_caches=None):
    use_cache = kv_caches is not None and all(kv is not None for kv in kv_caches)
    # TODO(synk): embedding gather kept in plain JAX (no clean tiny Pallas gather).
    if use_cache:
        x = jnp.take(params["embed"], input_ids[:, -1:], axis=0)
    else:
        x = jnp.take(params["embed"], input_ids, axis=0)
    # dropout(p=0.0) == identity
    B, S, E = x.shape
    past = kv_caches[0].shape[1] if use_cache else 0
    tables = _rope_tables(past, S, B)
    x2 = x.reshape(B * S, E)

    if use_cache:
        past_kv = jnp.stack([kv.reshape(B * past, KV_LORA) for kv in kv_caches])
        past_kr = jnp.stack([kr.reshape(B * past, QK_ROPE) for kr in kr_caches])
    else:
        past_kv = past_kr = None

    kv_new, kr_new, logits = _fused_call(x2, tables, params, past_kv, past_kr,
                                         B=B, S=S, T_PAST=past)

    new_kv, new_kr = [], []
    for l in range(N_LAYERS):
        kv_l = kv_new[l].reshape(B, S, KV_LORA)
        kr_l = kr_new[l].reshape(B, S, QK_ROPE)
        if use_cache:
            # TODO(synk): for long decode, preallocate max_T caches and write new
            # rows in place via input_output_aliases instead of concatenating.
            kv_l = jnp.concatenate([kv_caches[l], kv_l], axis=1)
            kr_l = jnp.concatenate([kr_caches[l], kr_l], axis=1)
        new_kv.append(kv_l)
        new_kr.append(kr_l)
    return logits.reshape(B, S, VOCAB), new_kv, new_kr


transformer_forward_jit = jax.jit(transformer_forward)


# ----------------------------- params -----------------------------
def init_params(key):
    keys = iter(jax.random.split(key, 16))

    def nrm(shape):
        return 0.02 * jax.random.normal(next(keys), shape, jnp.float32)

    def nrm_l(shape):
        return 0.02 * jax.random.normal(next(keys), (N_LAYERS,) + shape, jnp.float32)

    # fused projection columns: [q_nope(32) | q_rope(32) | c_kv(16) | k_r(8)],
    # zero-padded to 128 output lanes for lane-dense stores / fuller MXU tiles.
    w_qkr = nrm_l((EMBED, PROJ_W))
    w_qkr = jnp.pad(w_qkr, ((0, 0), (0, 0), (0, PROJ_PAD - PROJ_W)))

    return {
        "embed": nrm((VOCAB, EMBED)),
        "norm_w": jnp.ones((1, EMBED), jnp.float32),
        "head_w": nrm((EMBED, VOCAB)),
        "attn_norm_w": jnp.ones((N_LAYERS, 1, EMBED), jnp.float32),
        "w_qkr": w_qkr,
        "b_qkr": jnp.zeros((N_LAYERS, 1, PROJ_PAD), jnp.float32),
        # kv up-projection columns: [k_nope all heads (32) | v all heads (32)]
        "w_ukv": nrm_l((KV_LORA, DKV_ALL)),
        "b_ukv": jnp.zeros((N_LAYERS, 1, DKV_ALL), jnp.float32),
        "w_o": nrm_l((N_HEADS * V_HEAD, EMBED)),
        "b_o": jnp.zeros((N_LAYERS, 1, EMBED), jnp.float32),
        "mlp_norm_w": jnp.ones((N_LAYERS, 1, EMBED), jnp.float32),
        "w_mlp1": nrm_l((EMBED, MLP_HIDDEN)),
        "b_mlp1": jnp.zeros((N_LAYERS, 1, MLP_HIDDEN), jnp.float32),
        "w_mlp2": nrm_l((MLP_HIDDEN, EMBED)),
        "b_mlp2": jnp.zeros((N_LAYERS, 1, EMBED), jnp.float32),
    }


if __name__ == "__main__":
    key = jax.random.PRNGKey(0)
    pkey, ikey = jax.random.split(key)
    params = init_params(pkey)

    B, S = 2, 8
    input_ids = jax.random.randint(ikey, (B, S), 0, VOCAB)

    logits, kv_caches, kr_caches = transformer_forward_jit(params, input_ids)
    jax.block_until_ready(logits)

    assert logits.shape == (B, S, VOCAB)
    assert len(kv_caches) == N_LAYERS and kv_caches[0].shape == (B, S, KV_LORA)
    assert len(kr_caches) == N_LAYERS and kr_caches[0].shape == (B, S, QK_ROPE)
    print("KERNEL_OK")
</pallas_src>

<mosaic_0001>
module attributes {stable_mosaic.version = 11 : i64} {
  func.func @_fused_forward_kernel(%arg0: i32, %arg1: memref<16x32xf32, #tpu.memory_space<vmem>>, %arg2: memref<16x128xf32, #tpu.memory_space<vmem>>, %arg3: memref<16x128xf32, #tpu.memory_space<vmem>>, %arg4: memref<16x128xf32, #tpu.memory_space<vmem>>, %arg5: memref<1x1x32xf32, #tpu.memory_space<vmem>>, %arg6: memref<1x32x128xf32, #tpu.memory_space<vmem>>, %arg7: memref<1x1x128xf32, #tpu.memory_space<vmem>>, %arg8: memref<1x16x64xf32, #tpu.memory_space<vmem>>, %arg9: memref<1x1x64xf32, #tpu.memory_space<vmem>>, %arg10: memref<1x32x32xf32, #tpu.memory_space<vmem>>, %arg11: memref<1x1x32xf32, #tpu.memory_space<vmem>>, %arg12: memref<1x1x32xf32, #tpu.memory_space<vmem>>, %arg13: memref<1x32x128xf32, #tpu.memory_space<vmem>>, %arg14: memref<1x1x128xf32, #tpu.memory_space<vmem>>, %arg15: memref<1x128x32xf32, #tpu.memory_space<vmem>>, %arg16: memref<1x1x32xf32, #tpu.memory_space<vmem>>, %arg17: memref<1x32xf32, #tpu.memory_space<vmem>>, %arg18: memref<32x64xf32, #tpu.memory_space<vmem>>, %arg19: memref<1x16x16xf32, #tpu.memory_space<vmem>>, %arg20: memref<1x16x8xf32, #tpu.memory_space<vmem>>, %arg21: memref<16x64xf32, #tpu.memory_space<vmem>>, %arg22: memref<16x32xf32, #tpu.memory_space<vmem>>, %arg23: memref<16x32xf32, #tpu.memory_space<vmem>>) attributes {dimension_semantics = [#tpu.dimension_semantics<arbitrary>], iteration_bounds = array<i64: 2>, scalar_prefetch = 0 : i64, scratch_operands = 2 : i64, tpu.core_type = #tpu.core_type<tc>, window_params = [{pipeline_mode = #tpu.pipeline_mode<synchronous>, transform_indices = @transform_0, window_bounds = array<i64: 16, 32>}, {pipeline_mode = #tpu.pipeline_mode<synchronous>, transform_indices = @transform_1, window_bounds = array<i64: 16, 128>}, {pipeline_mode = #tpu.pipeline_mode<synchronous>, transform_indices = @transform_2, window_bounds = array<i64: 16, 128>}, {pipeline_mode = #tpu.pipeline_mode<synchronous>, transform_indices = @transform_3, window_bounds = array<i64: 16, 128>}, {transform_indices = @transform_4, window_bounds = array<i64: 1, 1, 32>}, {transform_indices = @transform_5, window_bounds = array<i64: 1, 32, 128>}, {transform_indices = @transform_6, window_bounds = array<i64: 1, 1, 128>}, {transform_indices = @transform_7, window_bounds = array<i64: 1, 16, 64>}, {transform_indices = @transform_8, window_bounds = array<i64: 1, 1, 64>}, {transform_indices = @transform_9, window_bounds = array<i64: 1, 32, 32>}, {transform_indices = @transform_10, window_bounds = array<i64: 1, 1, 32>}, {transform_indices = @transform_11, window_bounds = array<i64: 1, 1, 32>}, {transform_indices = @transform_12, window_bounds = array<i64: 1, 32, 128>}, {transform_indices = @transform_13, window_bounds = array<i64: 1, 1, 128>}, {transform_indices = @transform_14, window_bounds = array<i64: 1, 128, 32>}, {transform_indices = @transform_15, window_bounds = array<i64: 1, 1, 32>}, {pipeline_mode = #tpu.pipeline_mode<synchronous>, transform_indices = @transform_16, window_bounds = array<i64: 1, 32>}, {pipeline_mode = #tpu.pipeline_mode<synchronous>, transform_indices = @transform_17, window_bounds = array<i64: 32, 64>}, {transform_indices = @transform_18, window_bounds = array<i64: 1, 16, 16>}, {transform_indices = @transform_19, window_bounds = array<i64: 1, 16, 8>}, {pipeline_mode = #tpu.pipeline_mode<synchronous>, transform_indices = @transform_20, window_bounds = array<i64: 16, 64>}]} {
    %c0_i32 = arith.constant 0 : i32
    %0 = arith.cmpi eq, %arg0, %c0_i32 : i32
    %1 = arith.extui %0 : i1 to i32
    %c0_i32_0 = arith.constant 0 : i32
    %2 = arith.cmpi ne, %1, %c0_i32_0 : i32
    scf.if %2 {
      %c0_137 = arith.constant 0 : index
      %c0_138 = arith.constant 0 : index
      %342 = vector.load %arg1[%c0_137, %c0_138] : memref<16x32xf32, #tpu.memory_space<vmem>>, vector<16x32xf32>
      %c0_139 = arith.constant 0 : index
      %c0_140 = arith.constant 0 : index
      %343 = vector.load %arg22[%c0_139, %c0_140] : memref<16x32xf32, #tpu.memory_space<vmem>>, vector<16x32xf32>
      tpu.vector_store %arg22[%c0_139, %c0_140], %342 {strides = array<i32>} : memref<16x32xf32, #tpu.memory_space<vmem>>, vector<16x32xf32>,
    } else {
    }
    %c0 = arith.constant 0 : index
    %c0_1 = arith.constant 0 : index
    %3 = vector.load %arg22[%c0, %c0_1] : memref<16x32xf32, #tpu.memory_space<vmem>>, vector<16x32xf32>
    %c0_2 = arith.constant 0 : index
    %c0_3 = arith.constant 0 : index
    %c0_4 = arith.constant 0 : index
    %4 = vector.load %arg5[%c0_2, %c0_3, %c0_4] : memref<1x1x32xf32, #tpu.memory_space<vmem>>, vector<1x1x32xf32>
    %5 = vector.shape_cast %4 : vector<1x1x32xf32> to vector<1x32xf32>
    %6 = arith.mulf %3, %3 : vector<16x32xf32>
    %cst = arith.constant dense<0.000000e+00> : vector<16xf32>
    %7 = vector.multi_reduction <add>, %6, %cst [1] : vector<16x32xf32> to vector<16xf32>
    %8 = vector.shape_cast %7 : vector<16xf32> to vector<16x1xf32>
    %cst_5 = arith.constant 3.200000e+01 : f32
    %9 = vector.broadcast %cst_5 : f32 to vector<16x1xf32>
    %10 = arith.divf %8, %9 : vector<16x1xf32>
    %cst_6 = arith.constant 1.1920929E-7 : f32
    %11 = vector.broadcast %cst_6 : f32 to vector<16x1xf32>
    %12 = arith.addf %10, %11 : vector<16x1xf32>
    %13 = math.rsqrt %12 : vector<16x1xf32>
    %14 = vector.broadcast %13 : vector<16x1xf32> to vector<16x32xf32>
    %15 = arith.mulf %3, %14 : vector<16x32xf32>
    %16 = vector.broadcast %5 : vector<1x32xf32> to vector<16x32xf32>
    %17 = arith.mulf %15, %16 : vector<16x32xf32>
    %c0_7 = arith.constant 0 : index
    %c0_8 = arith.constant 0 : index
    %c0_9 = arith.constant 0 : index
    %18 = vector.load %arg6[%c0_7, %c0_8, %c0_9] : memref<1x32x128xf32, #tpu.memory_space<vmem>>, vector<1x32x128xf32>
    %19 = vector.shape_cast %18 : vector<1x32x128xf32> to vector<32x128xf32>
    %20 = arith.truncf %17 : vector<16x32xf32> to vector<16x32xbf16>
    %21 = arith.truncf %19 : vector<32x128xf32> to vector<32x128xbf16>
    %cst_10 = arith.constant dense<0.000000e+00> : vector<16x128xf32>
    %22 = tpu.matmul %20, %21, %cst_10 {dimension_numbers = #tpu.dot_dimension_numbers<[1], [0], [0], [1], [0, 0, 1, 1], [], []>} : vector<16x32xbf16>, vector<32x128xbf16>, vector<16x128xf32> -> vector<16x128xf32>
    %c0_11 = arith.constant 0 : index
    %c0_12 = arith.constant 0 : index
    %c0_13 = arith.constant 0 : index
    %23 = vector.load %arg7[%c0_11, %c0_12, %c0_13] : memref<1x1x128xf32, #tpu.memory_space<vmem>>, vector<1x1x128xf32>
    %24 = vector.shape_cast %23 : vector<1x1x128xf32> to vector<1x128xf32>
    %25 = vector.broadcast %24 : vector<1x128xf32> to vector<16x128xf32>
    %26 = arith.addf %22, %25 : vector<16x128xf32>
    %c0_14 = arith.constant 0 : index
    %c0_15 = arith.constant 0 : index
    %27 = vector.load %arg2[%c0_14, %c0_15] : memref<16x128xf32, #tpu.memory_space<vmem>>, vector<16x128xf32>
    %28 = arith.mulf %26, %27 : vector<16x128xf32>
    %c124_i32 = arith.constant 124 : i32
    %29 = tpu.dynamic_rotate %26 by %c124_i32 dim 1 : vector<16x128xf32>, i32 -> vector<16x128xf32>
    %c0_16 = arith.constant 0 : index
    %c0_17 = arith.constant 0 : index
    %30 = vector.load %arg3[%c0_16, %c0_17] : memref<16x128xf32, #tpu.memory_space<vmem>>, vector<16x128xf32>
    %31 = arith.mulf %29, %30 : vector<16x128xf32>
    %32 = arith.addf %28, %31 : vector<16x128xf32>
    %c4_i32 = arith.constant 4 : i32
    %33 = tpu.dynamic_rotate %26 by %c4_i32 dim 1 : vector<16x128xf32>, i32 -> vector<16x128xf32>
    %c0_18 = arith.constant 0 : index
    %c0_19 = arith.constant 0 : index
    %34 = vector.load %arg4[%c0_18, %c0_19] : memref<16x128xf32, #tpu.memory_space<vmem>>, vector<16x128xf32>
    %35 = arith.mulf %33, %34 : vector<16x128xf32>
    %36 = arith.addf %32, %35 : vector<16x128xf32>
    %37 = vector.extract_strided_slice %36 {offsets = [0, 0], sizes = [16, 32], strides = [1, 1]} : vector<16x128xf32> to vector<16x32xf32>
    %38 = vector.extract_strided_slice %36 {offsets = [0, 32], sizes = [16, 32], strides = [1, 1]} : vector<16x128xf32> to vector<16x32xf32>
    %39 = vector.extract_strided_slice %36 {offsets = [0, 64], sizes = [16, 16], strides = [1, 1]} : vector<16x128xf32> to vector<16x16xf32>
    %40 = vector.extract_strided_slice %36 {offsets = [0, 80], sizes = [16, 8], strides = [1, 1]} : vector<16x128xf32> to vector<16x8xf32>
    %c0_20 = arith.constant 0 : index
    %c0_21 = arith.constant 0 : index
    %c0_22 = arith.constant 0 : index
    %41 = vector.load %arg19[%c0_20, %c0_21, %c0_22] : memref<1x16x16xf32, #tpu.memory_space<vmem>>, vector<1x16x16xf32>
    %42 = vector.shape_cast %41 : vector<1x16x16xf32> to vector<16x16xf32>
    %43 = vector.shape_cast %39 : vector<16x16xf32> to vector<1x16x16xf32>
    tpu.vector_store %arg19[%c0_20, %c0_21, %c0_22], %43 {strides = array<i32>} : memref<1x16x16xf32, #tpu.memory_space<vmem>>, vector<1x16x16xf32>,
    %c0_23 = arith.constant 0 : index
    %c0_24 = arith.constant 0 : index
    %c0_25 = arith.constant 0 : index
    %44 = vector.load %arg20[%c0_23, %c0_24, %c0_25] : memref<1x16x8xf32, #tpu.memory_space<vmem>>, vector<1x16x8xf32>
    %45 = vector.shape_cast %44 : vector<1x16x8xf32> to vector<16x8xf32>
    %46 = vector.shape_cast %40 : vector<16x8xf32> to vector<1x16x8xf32>
    tpu.vector_store %arg20[%c0_23, %c0_24, %c0_25], %46 {strides = array<i32>} : memref<1x16x8xf32, #tpu.memory_space<vmem>>, vector<1x16x8xf32>,
    %c0_26 = arith.constant 0 : index
    %c0_27 = arith.constant 0 : index
    %c0_28 = arith.constant 0 : index
    %47 = vector.load %arg8[%c0_26, %c0_27, %c0_28] : memref<1x16x64xf32, #tpu.memory_space<vmem>>, vector<1x16x64xf32>
    %48 = vector.shape_cast %47 : vector<1x16x64xf32> to vector<16x64xf32>
    %49 = arith.truncf %48 : vector<16x64xf32> to vector<16x64xbf16>
    %c0_29 = arith.constant 0 : index
    %c0_30 = arith.constant 0 : index
    %c0_31 = arith.constant 0 : index
    %50 = vector.load %arg9[%c0_29, %c0_30, %c0_31] : memref<1x1x64xf32, #tpu.memory_space<vmem>>, vector<1x1x64xf32>
    %51 = vector.shape_cast %50 : vector<1x1x64xf32> to vector<1x64xf32>
    %52 = arith.truncf %39 : vector<16x16xf32> to vector<16x16xbf16>
    %cst_32 = arith.constant dense<0.000000e+00> : vector<16x64xf32>
    %53 = tpu.matmul %52, %49, %cst_32 {dimension_numbers = #tpu.dot_dimension_numbers<[1], [0], [0], [1], [0, 0, 1, 1], [], []>} : vector<16x16xbf16>, vector<16x64xbf16>, vector<16x64xf32> -> vector<16x64xf32>
    %54 = vector.broadcast %51 : vector<1x64xf32> to vector<16x64xf32>
    %55 = arith.addf %53, %54 : vector<16x64xf32>
    %56 = arith.truncf %55 : vector<16x64xf32> to vector<16x64xbf16>
    %57 = arith.truncf %40 : vector<16x8xf32> to vector<16x8xbf16>
    %58 = arith.truncf %37 : vector<16x32xf32> to vector<16x32xbf16>
    %59 = arith.truncf %38 : vector<16x32xf32> to vector<16x32xbf16>
    %c0_33 = arith.constant 0 : index
    %c0_34 = arith.constant 0 : index
    %c0_35 = arith.constant 0 : index
    %60 = vector.load %arg10[%c0_33, %c0_34, %c0_35] : memref<1x32x32xf32, #tpu.memory_space<vmem>>, vector<1x32x32xf32>
    %61 = vector.shape_cast %60 : vector<1x32x32xf32> to vector<32x32xf32>
    %62 = arith.truncf %61 : vector<32x32xf32> to vector<32x32xbf16>
    %63 = tpu.iota {dimensions = array<i32: 0>} : vector<8x8xi32>
    %64 = tpu.iota {dimensions = array<i32: 1>} : vector<8x8xi32>
    %65 = arith.cmpi sle, %64, %63 : vector<8x8xi32>
    %66 = vector.extract_strided_slice %58 {offsets = [0, 0], sizes = [8, 32], strides = [1, 1]} : vector<16x32xbf16> to vector<8x32xbf16>
    %67 = vector.extract_strided_slice %59 {offsets = [0, 0], sizes = [8, 32], strides = [1, 1]} : vector<16x32xbf16> to vector<8x32xbf16>
    %68 = vector.extract_strided_slice %56 {offsets = [0, 0], sizes = [8, 64], strides = [1, 1]} : vector<16x64xbf16> to vector<8x64xbf16>
    %69 = vector.extract_strided_slice %57 {offsets = [0, 0], sizes = [8, 8], strides = [1, 1]} : vector<16x8xbf16> to vector<8x8xbf16>
    %cst_36 = arith.constant 0.000000e+00 : f32
    %70 = vector.broadcast %cst_36 : f32 to vector<8x32xf32>
    %71 = vector.extract_strided_slice %66 {offsets = [0, 0], sizes = [8, 8], strides = [1, 1]} : vector<8x32xbf16> to vector<8x8xbf16>
    %72 = vector.extract_strided_slice %67 {offsets = [0, 0], sizes = [8, 8], strides = [1, 1]} : vector<8x32xbf16> to vector<8x8xbf16>
    %73 = vector.extract_strided_slice %68 {offsets = [0, 0], sizes = [8, 8], strides = [1, 1]} : vector<8x64xbf16> to vector<8x8xbf16>
    %74 = vector.extract_strided_slice %68 {offsets = [0, 32], sizes = [8, 8], strides = [1, 1]} : vector<8x64xbf16> to vector<8x8xbf16>
    %cst_37 = arith.constant dense<0.000000e+00> : vector<8x8xf32>
    %75 = tpu.matmul %71, %73, %cst_37 {dimension_numbers = #tpu.dot_dimension_numbers<[1], [1], [0], [0], [0, 0, 1, 0], [], []>} : vector<8x8xbf16>, vector<8x8xbf16>, vector<8x8xf32> -> vector<8x8xf32>
    %cst_38 = arith.constant dense<0.000000e+00> : vector<8x8xf32>
    %76 = tpu.matmul %72, %69, %cst_38 {dimension_numbers = #tpu.dot_dimension_numbers<[1], [1], [0], [0], [0, 0, 1, 0], [], []>} : vector<8x8xbf16>, vector<8x8xbf16>, vector<8x8xf32> -> vector<8x8xf32>
    %77 = arith.addf %75, %76 : vector<8x8xf32>
    %cst_39 = arith.constant 2.500000e-01 : f32
    %78 = vector.broadcast %cst_39 : f32 to vector<8x8xf32>
    %79 = arith.mulf %77, %78 : vector<8x8xf32>
    %cst_40 = arith.constant -1.000000e+30 : f32
    %80 = vector.broadcast %cst_40 : f32 to vector<8x8xf32>
    %81 = arith.select %65, %79, %80 : vector<8x8xi1>, vector<8x8xf32>
    %cst_41 = arith.constant dense<0xFF800000> : vector<8xf32>
    %82 = vector.multi_reduction <maximumf>, %81, %cst_41 [1] : vector<8x8xf32> to vector<8xf32>
    %83 = vector.shape_cast %82 : vector<8xf32> to vector<8x1xf32>
    %84 = vector.broadcast %83 : vector<8x1xf32> to vector<8x8xf32>
    %85 = arith.subf %81, %84 : vector<8x8xf32>
    %86 = math.exp %85 : vector<8x8xf32>
    %cst_42 = arith.constant dense<0.000000e+00> : vector<8xf32>
    %87 = vector.multi_reduction <add>, %86, %cst_42 [1] : vector<8x8xf32> to vector<8xf32>
    %88 = vector.shape_cast %87 : vector<8xf32> to vector<8x1xf32>
    %89 = arith.truncf %86 : vector<8x8xf32> to vector<8x8xbf16>
    %cst_43 = arith.constant dense<0.000000e+00> : vector<8x8xf32>
    %90 = tpu.matmul %89, %74, %cst_43 {dimension_numbers = #tpu.dot_dimension_numbers<[1], [0], [0], [1], [0, 0, 1, 1], [], []>} : vector<8x8xbf16>, vector<8x8xbf16>, vector<8x8xf32> -> vector<8x8xf32>
    %91 = vector.broadcast %88 : vector<8x1xf32> to vector<8x8xf32>
    %92 = arith.divf %90, %91 : vector<8x8xf32>
    %93 = arith.truncf %92 : vector<8x8xf32> to vector<8x8xbf16>
    %94 = vector.extract_strided_slice %62 {offsets = [0, 0], sizes = [8, 32], strides = [1, 1]} : vector<32x32xbf16> to vector<8x32xbf16>
    %cst_44 = arith.constant dense<0.000000e+00> : vector<8x32xf32>
    %95 = tpu.matmul %93, %94, %cst_44 {dimension_numbers = #tpu.dot_dimension_numbers<[1], [0], [0], [1], [0, 0, 1, 1], [], []>} : vector<8x8xbf16>, vector<8x32xbf16>, vector<8x32xf32> -> vector<8x32xf32>
    %96 = arith.addf %70, %95 : vector<8x32xf32>
    %97 = vector.extract_strided_slice %66 {offsets = [0, 8], sizes = [8, 8], strides = [1, 1]} : vector<8x32xbf16> to vector<8x8xbf16>
    %98 = vector.extract_strided_slice %67 {offsets = [0, 8], sizes = [8, 8], strides = [1, 1]} : vector<8x32xbf16> to vector<8x8xbf16>
    %99 = vector.extract_strided_slice %68 {offsets = [0, 8], sizes = [8, 8], strides = [1, 1]} : vector<8x64xbf16> to vector<8x8xbf16>
    %100 = vector.extract_strided_slice %68 {offsets = [0, 40], sizes = [8, 8], strides = [1, 1]} : vector<8x64xbf16> to vector<8x8xbf16>
    %cst_45 = arith.constant dense<0.000000e+00> : vector<8x8xf32>
    %101 = tpu.matmul %97, %99, %cst_45 {dimension_numbers = #tpu.dot_dimension_numbers<[1], [1], [0], [0], [0, 0, 1, 0], [], []>} : vector<8x8xbf16>, vector<8x8xbf16>, vector<8x8xf32> -> vector<8x8xf32>
    %cst_46 = arith.constant dense<0.000000e+00> : vector<8x8xf32>
    %102 = tpu.matmul %98, %69, %cst_46 {dimension_numbers = #tpu.dot_dimension_numbers<[1], [1], [0], [0], [0, 0, 1, 0], [], []>} : vector<8x8xbf16>, vector<8x8xbf16>, vector<8x8xf32> -> vector<8x8xf32>
    %103 = arith.addf %101, %102 : vector<8x8xf32>
    %cst_47 = arith.constant 2.500000e-01 : f32
    %104 = vector.broadcast %cst_47 : f32 to vector<8x8xf32>
    %105 = arith.mulf %103, %104 : vector<8x8xf32>
    %cst_48 = arith.constant -1.000000e+30 : f32
    %106 = vector.broadcast %cst_48 : f32 to vector<8x8xf32>
    %107 = arith.select %65, %105, %106 : vector<8x8xi1>, vector<8x8xf32>
    %cst_49 = arith.constant dense<0xFF800000> : vector<8xf32>
    %108 = vector.multi_reduction <maximumf>, %107, %cst_49 [1] : vector<8x8xf32> to vector<8xf32>
    %109 = vector.shape_cast %108 : vector<8xf32> to vector<8x1xf32>
    %110 = vector.broadcast %109 : vector<8x1xf32> to vector<8x8xf32>
    %111 = arith.subf %107, %110 : vector<8x8xf32>
    %112 = math.exp %111 : vector<8x8xf32>
    %cst_50 = arith.constant dense<0.000000e+00> : vector<8xf32>
    %113 = vector.multi_reduction <add>, %112, %cst_50 [1] : vector<8x8xf32> to vector<8xf32>
    %114 = vector.shape_cast %113 : vector<8xf32> to vector<8x1xf32>
    %115 = arith.truncf %112 : vector<8x8xf32> to vector<8x8xbf16>
    %cst_51 = arith.constant dense<0.000000e+00> : vector<8x8xf32>
    %116 = tpu.matmul %115, %100, %cst_51 {dimension_numbers = #tpu.dot_dimension_numbers<[1], [0], [0], [1], [0, 0, 1, 1], [], []>} : vector<8x8xbf16>, vector<8x8xbf16>, vector<8x8xf32> -> vector<8x8xf32>
    %117 = vector.broadcast %114 : vector<8x1xf32> to vector<8x8xf32>
    %118 = arith.divf %116, %117 : vector<8x8xf32>
    %119 = arith.truncf %118 : vector<8x8xf32> to vector<8x8xbf16>
    %120 = vector.extract_strided_slice %62 {offsets = [8, 0], sizes = [8, 32], strides = [1, 1]} : vector<32x32xbf16> to vector<8x32xbf16>
    %cst_52 = arith.constant dense<0.000000e+00> : vector<8x32xf32>
    %121 = tpu.matmul %119, %120, %cst_52 {dimension_numbers = #tpu.dot_dimension_numbers<[1], [0], [0], [1], [0, 0, 1, 1], [], []>} : vector<8x8xbf16>, vector<8x32xbf16>, vector<8x32xf32> -> vector<8x32xf32>
    %122 = arith.addf %96, %121 : vector<8x32xf32>
    %123 = vector.extract_strided_slice %66 {offsets = [0, 16], sizes = [8, 8], strides = [1, 1]} : vector<8x32xbf16> to vector<8x8xbf16>
    %124 = vector.extract_strided_slice %67 {offsets = [0, 16], sizes = [8, 8], strides = [1, 1]} : vector<8x32xbf16> to vector<8x8xbf16>
    %125 = vector.extract_strided_slice %68 {offsets = [0, 16], sizes = [8, 8], strides = [1, 1]} : vector<8x64xbf16> to vector<8x8xbf16>
    %126 = vector.extract_strided_slice %68 {offsets = [0, 48], sizes = [8, 8], strides = [1, 1]} : vector<8x64xbf16> to vector<8x8xbf16>
    %cst_53 = arith.constant dense<0.000000e+00> : vector<8x8xf32>
    %127 = tpu.matmul %123, %125, %cst_53 {dimension_numbers = #tpu.dot_dimension_numbers<[1], [1], [0], [0], [0, 0, 1, 0], [], []>} : vector<8x8xbf16>, vector<8x8xbf16>, vector<8x8xf32> -> vector<8x8xf32>
    %cst_54 = arith.constant dense<0.000000e+00> : vector<8x8xf32>
    %128 = tpu.matmul %124, %69, %cst_54 {dimension_numbers = #tpu.dot_dimension_numbers<[1], [1], [0], [0], [0, 0, 1, 0], [], []>} : vector<8x8xbf16>, vector<8x8xbf16>, vector<8x8xf32> -> vector<8x8xf32>
    %129 = arith.addf %127, %128 : vector<8x8xf32>
    %cst_55 = arith.constant 2.500000e-01 : f32
    %130 = vector.broadcast %cst_55 : f32 to vector<8x8xf32>
    %131 = arith.mulf %129, %130 : vector<8x8xf32>
    %cst_56 = arith.constant -1.000000e+30 : f32
    %132 = vector.broadcast %cst_56 : f32 to vector<8x8xf32>
    %133 = arith.select %65, %131, %132 : vector<8x8xi1>, vector<8x8xf32>
    %cst_57 = arith.constant dense<0xFF800000> : vector<8xf32>
    %134 = vector.multi_reduction <maximumf>, %133, %cst_57 [1] : vector<8x8xf32> to vector<8xf32>
    %135 = vector.shape_cast %134 : vector<8xf32> to vector<8x1xf32>
    %136 = vector.broadcast %135 : vector<8x1xf32> to vector<8x8xf32>
    %137 = arith.subf %133, %136 : vector<8x8xf32>
    %138 = math.exp %137 : vector<8x8xf32>
    %cst_58 = arith.constant dense<0.000000e+00> : vector<8xf32>
    %139 = vector.multi_reduction <add>, %138, %cst_58 [1] : vector<8x8xf32> to vector<8xf32>
    %140 = vector.shape_cast %139 : vector<8xf32> to vector<8x1xf32>
    %141 = arith.truncf %138 : vector<8x8xf32> to vector<8x8xbf16>
    %cst_59 = arith.constant dense<0.000000e+00> : vector<8x8xf32>
    %142 = tpu.matmul %141, %126, %cst_59 {dimension_numbers = #tpu.dot_dimension_numbers<[1], [0], [0], [1], [0, 0, 1, 1], [], []>} : vector<8x8xbf16>, vector<8x8xbf16>, vector<8x8xf32> -> vector<8x8xf32>
    %143 = vector.broadcast %140 : vector<8x1xf32> to vector<8x8xf32>
    %144 = arith.divf %142, %143 : vector<8x8xf32>
    %145 = arith.truncf %144 : vector<8x8xf32> to vector<8x8xbf16>
    %146 = vector.extract_strided_slice %62 {offsets = [16, 0], sizes = [8, 32], strides = [1, 1]} : vector<32x32xbf16> to vector<8x32xbf16>
    %cst_60 = arith.constant dense<0.000000e+00> : vector<8x32xf32>
    %147 = tpu.matmul %145, %146, %cst_60 {dimension_numbers = #tpu.dot_dimension_numbers<[1], [0], [0], [1], [0, 0, 1, 1], [], []>} : vector<8x8xbf16>, vector<8x32xbf16>, vector<8x32xf32> -> vector<8x32xf32>
    %148 = arith.addf %122, %147 : vector<8x32xf32>
    %149 = vector.extract_strided_slice %66 {offsets = [0, 24], sizes = [8, 8], strides = [1, 1]} : vector<8x32xbf16> to vector<8x8xbf16>
    %150 = vector.extract_strided_slice %67 {offsets = [0, 24], sizes = [8, 8], strides = [1, 1]} : vector<8x32xbf16> to vector<8x8xbf16>
    %151 = vector.extract_strided_slice %68 {offsets = [0, 24], sizes = [8, 8], strides = [1, 1]} : vector<8x64xbf16> to vector<8x8xbf16>
    %152 = vector.extract_strided_slice %68 {offsets = [0, 56], sizes = [8, 8], strides = [1, 1]} : vector<8x64xbf16> to vector<8x8xbf16>
    %cst_61 = arith.constant dense<0.000000e+00> : vector<8x8xf32>
    %153 = tpu.matmul %149, %151, %cst_61 {dimension_numbers = #tpu.dot_dimension_numbers<[1], [1], [0], [0], [0, 0, 1, 0], [], []>} : vector<8x8xbf16>, vector<8x8xbf16>, vector<8x8xf32> -> vector<8x8xf32>
    %cst_62 = arith.constant dense<0.000000e+00> : vector<8x8xf32>
    %154 = tpu.matmul %150, %69, %cst_62 {dimension_numbers = #tpu.dot_dimension_numbers<[1], [1], [0], [0], [0, 0, 1, 0], [], []>} : vector<8x8xbf16>, vector<8x8xbf16>, vector<8x8xf32> -> vector<8x8xf32>
    %155 = arith.addf %153, %154 : vector<8x8xf32>
    %cst_63 = arith.constant 2.500000e-01 : f32
    %156 = vector.broadcast %cst_63 : f32 to vector<8x8xf32>
    %157 = arith.mulf %155, %156 : vector<8x8xf32>
    %cst_64 = arith.constant -1.000000e+30 : f32
    %158 = vector.broadcast %cst_64 : f32 to vector<8x8xf32>
    %159 = arith.select %65, %157, %158 : vector<8x8xi1>, vector<8x8xf32>
    %cst_65 = arith.constant dense<0xFF800000> : vector<8xf32>
    %160 = vector.multi_reduction <maximumf>, %159, %cst_65 [1] : vector<8x8xf32> to vector<8xf32>
    %161 = vector.shape_cast %160 : vector<8xf32> to vector<8x1xf32>
    %162 = vector.broadcast %161 : vector<8x1xf32> to vector<8x8xf32>
    %163 = arith.subf %159, %162 : vector<8x8xf32>
    %164 = math.exp %163 : vector<8x8xf32>
    %cst_66 = arith.constant dense<0.000000e+00> : vector<8xf32>
    %165 = vector.multi_reduction <add>, %164, %cst_66 [1] : vector<8x8xf32> to vector<8xf32>
    %166 = vector.shape_cast %165 : vector<8xf32> to vector<8x1xf32>
    %167 = arith.truncf %164 : vector<8x8xf32> to vector<8x8xbf16>
    %cst_67 = arith.constant dense<0.000000e+00> : vector<8x8xf32>
    %168 = tpu.matmul %167, %152, %cst_67 {dimension_numbers = #tpu.dot_dimension_numbers<[1], [0], [0], [1], [0, 0, 1, 1], [], []>} : vector<8x8xbf16>, vector<8x8xbf16>, vector<8x8xf32> -> vector<8x8xf32>
    %169 = vector.broadcast %166 : vector<8x1xf32> to vector<8x8xf32>
    %170 = arith.divf %168, %169 : vector<8x8xf32>
    %171 = arith.truncf %170 : vector<8x8xf32> to vector<8x8xbf16>
    %172 = vector.extract_strided_slice %62 {offsets = [24, 0], sizes = [8, 32], strides = [1, 1]} : vector<32x32xbf16> to vector<8x32xbf16>
    %cst_68 = arith.constant dense<0.000000e+00> : vector<8x32xf32>
    %173 = tpu.matmul %171, %172, %cst_68 {dimension_numbers = #tpu.dot_dimension_numbers<[1], [0], [0], [1], [0, 0, 1, 1], [], []>} : vector<8x8xbf16>, vector<8x32xbf16>, vector<8x32xf32> -> vector<8x32xf32>
    %174 = arith.addf %148, %173 : vector<8x32xf32>
    %c0_69 = arith.constant 0 : index
    %c0_70 = arith.constant 0 : index
    %175 = vector.load %arg23[%c0_69, %c0_70] : memref<16x32xf32, #tpu.memory_space<vmem>>, vector<8x32xf32>
    tpu.vector_store %arg23[%c0_69, %c0_70], %174 {strides = array<i32>} : memref<16x32xf32, #tpu.memory_space<vmem>>, vector<8x32xf32>,
    %176 = vector.extract_strided_slice %58 {offsets = [8, 0], sizes = [8, 32], strides = [1, 1]} : vector<16x32xbf16> to vector<8x32xbf16>
    %177 = vector.extract_strided_slice %59 {offsets = [8, 0], sizes = [8, 32], strides = [1, 1]} : vector<16x32xbf16> to vector<8x32xbf16>
    %178 = vector.extract_strided_slice %56 {offsets = [8, 0], sizes = [8, 64], strides = [1, 1]} : vector<16x64xbf16> to vector<8x64xbf16>
    %179 = vector.extract_strided_slice %57 {offsets = [8, 0], sizes = [8, 8], strides = [1, 1]} : vector<16x8xbf16> to vector<8x8xbf16>
    %cst_71 = arith.constant 0.000000e+00 : f32
    %180 = vector.broadcast %cst_71 : f32 to vector<8x32xf32>
    %181 = vector.extract_strided_slice %176 {offsets = [0, 0], sizes = [8, 8], strides = [1, 1]} : vector<8x32xbf16> to vector<8x8xbf16>
    %182 = vector.extract_strided_slice %177 {offsets = [0, 0], sizes = [8, 8], strides = [1, 1]} : vector<8x32xbf16> to vector<8x8xbf16>
    %183 = vector.extract_strided_slice %178 {offsets = [0, 0], sizes = [8, 8], strides = [1, 1]} : vector<8x64xbf16> to vector<8x8xbf16>
    %184 = vector.extract_strided_slice %178 {offsets = [0, 32], sizes = [8, 8], strides = [1, 1]} : vector<8x64xbf16> to vector<8x8xbf16>
    %cst_72 = arith.constant dense<0.000000e+00> : vector<8x8xf32>
    %185 = tpu.matmul %181, %183, %cst_72 {dimension_numbers = #tpu.dot_dimension_numbers<[1], [1], [0], [0], [0, 0, 1, 0], [], []>} : vector<8x8xbf16>, vector<8x8xbf16>, vector<8x8xf32> -> vector<8x8xf32>
    %cst_73 = arith.constant dense<0.000000e+00> : vector<8x8xf32>
    %186 = tpu.matmul %182, %179, %cst_73 {dimension_numbers = #tpu.dot_dimension_numbers<[1], [1], [0], [0], [0, 0, 1, 0], [], []>} : vector<8x8xbf16>, vector<8x8xbf16>, vector<8x8xf32> -> vector<8x8xf32>
    %187 = arith.addf %185, %186 : vector<8x8xf32>
    %cst_74 = arith.constant 2.500000e-01 : f32
    %188 = vector.broadcast %cst_74 : f32 to vector<8x8xf32>
    %189 = arith.mulf %187, %188 : vector<8x8xf32>
    %cst_75 = arith.constant -1.000000e+30 : f32
    %190 = vector.broadcast %cst_75 : f32 to vector<8x8xf32>
    %191 = arith.select %65, %189, %190 : vector<8x8xi1>, vector<8x8xf32>
    %cst_76 = arith.constant dense<0xFF800000> : vector<8xf32>
    %192 = vector.multi_reduction <maximumf>, %191, %cst_76 [1] : vector<8x8xf32> to vector<8xf32>
    %193 = vector.shape_cast %192 : vector<8xf32> to vector<8x1xf32>
    %194 = vector.broadcast %193 : vector<8x1xf32> to vector<8x8xf32>
    %195 = arith.subf %191, %194 : vector<8x8xf32>
    %196 = math.exp %195 : vector<8x8xf32>
    %cst_77 = arith.constant dense<0.000000e+00> : vector<8xf32>
    %197 = vector.multi_reduction <add>, %196, %cst_77 [1] : vector<8x8xf32> to vector<8xf32>
    %198 = vector.shape_cast %197 : vector<8xf32> to vector<8x1xf32>
    %199 = arith.truncf %196 : vector<8x8xf32> to vector<8x8xbf16>
    %cst_78 = arith.constant dense<0.000000e+00> : vector<8x8xf32>
    %200 = tpu.matmul %199, %184, %cst_78 {dimension_numbers = #tpu.dot_dimension_numbers<[1], [0], [0], [1], [0, 0, 1, 1], [], []>} : vector<8x8xbf16>, vector<8x8xbf16>, vector<8x8xf32> -> vector<8x8xf32>
    %201 = vector.broadcast %198 : vector<8x1xf32> to vector<8x8xf32>
    %202 = arith.divf %200, %201 : vector<8x8xf32>
    %203 = arith.truncf %202 : vector<8x8xf32> to vector<8x8xbf16>
    %204 = vector.extract_strided_slice %62 {offsets = [0, 0], sizes = [8, 32], strides = [1, 1]} : vector<32x32xbf16> to vector<8x32xbf16>
    %cst_79 = arith.constant dense<0.000000e+00> : vector<8x32xf32>
    %205 = tpu.matmul %203, %204, %cst_79 {dimension_numbers = #tpu.dot_dimension_numbers<[1], [0], [0], [1], [0, 0, 1, 1], [], []>} : vector<8x8xbf16>, vector<8x32xbf16>, vector<8x32xf32> -> vector<8x32xf32>
    %206 = arith.addf %180, %205 : vector<8x32xf32>
    %207 = vector.extract_strided_slice %176 {offsets = [0, 8], sizes = [8, 8], strides = [1, 1]} : vector<8x32xbf16> to vector<8x8xbf16>
    %208 = vector.extract_strided_slice %177 {offsets = [0, 8], sizes = [8, 8], strides = [1, 1]} : vector<8x32xbf16> to vector<8x8xbf16>
    %209 = vector.extract_strided_slice %178 {offsets = [0, 8], sizes = [8, 8], strides = [1, 1]} : vector<8x64xbf16> to vector<8x8xbf16>
    %210 = vector.extract_strided_slice %178 {offsets = [0, 40], sizes = [8, 8], strides = [1, 1]} : vector<8x64xbf16> to vector<8x8xbf16>
    %cst_80 = arith.constant dense<0.000000e+00> : vector<8x8xf32>
    %211 = tpu.matmul %207, %209, %cst_80 {dimension_numbers = #tpu.dot_dimension_numbers<[1], [1], [0], [0], [0, 0, 1, 0], [], []>} : vector<8x8xbf16>, vector<8x8xbf16>, vector<8x8xf32> -> vector<8x8xf32>
    %cst_81 = arith.constant dense<0.000000e+00> : vector<8x8xf32>
    %212 = tpu.matmul %208, %179, %cst_81 {dimension_numbers = #tpu.dot_dimension_numbers<[1], [1], [0], [0], [0, 0, 1, 0], [], []>} : vector<8x8xbf16>, vector<8x8xbf16>, vector<8x8xf32> -> vector<8x8xf32>
    %213 = arith.addf %211, %212 : vector<8x8xf32>
    %cst_82 = arith.constant 2.500000e-01 : f32
    %214 = vector.broadcast %cst_82 : f32 to vector<8x8xf32>
    %215 = arith.mulf %213, %214 : vector<8x8xf32>
    %cst_83 = arith.constant -1.000000e+30 : f32
    %216 = vector.broadcast %cst_83 : f32 to vector<8x8xf32>
    %217 = arith.select %65, %215, %216 : vector<8x8xi1>, vector<8x8xf32>
    %cst_84 = arith.constant dense<0xFF800000> : vector<8xf32>
    %218 = vector.multi_reduction <maximumf>, %217, %cst_84 [1] : vector<8x8xf32> to vector<8xf32>
    %219 = vector.shape_cast %218 : vector<8xf32> to vector<8x1xf32>
    %220 = vector.broadcast %219 : vector<8x1xf32> to vector<8x8xf32>
    %221 = arith.subf %217, %220 : vector<8x8xf32>
    %222 = math.exp %221 : vector<8x8xf32>
    %cst_85 = arith.constant dense<0.000000e+00> : vector<8xf32>
    %223 = vector.multi_reduction <add>, %222, %cst_85 [1] : vector<8x8xf32> to vector<8xf32>
    %224 = vector.shape_cast %223 : vector<8xf32> to vector<8x1xf32>
    %225 = arith.truncf %222 : vector<8x8xf32> to vector<8x8xbf16>
    %cst_86 = arith.constant dense<0.000000e+00> : vector<8x8xf32>
    %226 = tpu.matmul %225, %210, %cst_86 {dimension_numbers = #tpu.dot_dimension_numbers<[1], [0], [0], [1], [0, 0, 1, 1], [], []>} : vector<8x8xbf16>, vector<8x8xbf16>, vector<8x8xf32> -> vector<8x8xf32>
    %227 = vector.broadcast %224 : vector<8x1xf32> to vector<8x8xf32>
    %228 = arith.divf %226, %227 : vector<8x8xf32>
    %229 = arith.truncf %228 : vector<8x8xf32> to vector<8x8xbf16>
    %230 = vector.extract_strided_slice %62 {offsets = [8, 0], sizes = [8, 32], strides = [1, 1]} : vector<32x32xbf16> to vector<8x32xbf16>
    %cst_87 = arith.constant dense<0.000000e+00> : vector<8x32xf32>
    %231 = tpu.matmul %229, %230, %cst_87 {dimension_numbers = #tpu.dot_dimension_numbers<[1], [0], [0], [1], [0, 0, 1, 1], [], []>} : vector<8x8xbf16>, vector<8x32xbf16>, vector<8x32xf32> -> vector<8x32xf32>
    %232 = arith.addf %206, %231 : vector<8x32xf32>
    %233 = vector.extract_strided_slice %176 {offsets = [0, 16], sizes = [8, 8], strides = [1, 1]} : vector<8x32xbf16> to vector<8x8xbf16>
    %234 = vector.extract_strided_slice %177 {offsets = [0, 16], sizes = [8, 8], strides = [1, 1]} : vector<8x32xbf16> to vector<8x8xbf16>
    %235 = vector.extract_strided_slice %178 {offsets = [0, 16], sizes = [8, 8], strides = [1, 1]} : vector<8x64xbf16> to vector<8x8xbf16>
    %236 = vector.extract_strided_slice %178 {offsets = [0, 48], sizes = [8, 8], strides = [1, 1]} : vector<8x64xbf16> to vector<8x8xbf16>
    %cst_88 = arith.constant dense<0.000000e+00> : vector<8x8xf32>
    %237 = tpu.matmul %233, %235, %cst_88 {dimension_numbers = #tpu.dot_dimension_numbers<[1], [1], [0], [0], [0, 0, 1, 0], [], []>} : vector<8x8xbf16>, vector<8x8xbf16>, vector<8x8xf32> -> vector<8x8xf32>
    %cst_89 = arith.constant dense<0.000000e+00> : vector<8x8xf32>
    %238 = tpu.matmul %234, %179, %cst_89 {dimension_numbers = #tpu.dot_dimension_numbers<[1], [1], [0], [0], [0, 0, 1, 0], [], []>} : vector<8x8xbf16>, vector<8x8xbf16>, vector<8x8xf32> -> vector<8x8xf32>
    %239 = arith.addf %237, %238 : vector<8x8xf32>
    %cst_90 = arith.constant 2.500000e-01 : f32
    %240 = vector.broadcast %cst_90 : f32 to vector<8x8xf32>
    %241 = arith.mulf %239, %240 : vector<8x8xf32>
    %cst_91 = arith.constant -1.000000e+30 : f32
    %242 = vector.broadcast %cst_91 : f32 to vector<8x8xf32>
    %243 = arith.select %65, %241, %242 : vector<8x8xi1>, vector<8x8xf32>
    %cst_92 = arith.constant dense<0xFF800000> : vector<8xf32>
    %244 = vector.multi_reduction <maximumf>, %243, %cst_92 [1] : vector<8x8xf32> to vector<8xf32>
    %245 = vector.shape_cast %244 : vector<8xf32> to vector<8x1xf32>
    %246 = vector.broadcast %245 : vector<8x1xf32> to vector<8x8xf32>
    %247 = arith.subf %243, %246 : vector<8x8xf32>
    %248 = math.exp %247 : vector<8x8xf32>
    %cst_93 = arith.constant dense<0.000000e+00> : vector<8xf32>
    %249 = vector.multi_reduction <add>, %248, %cst_93 [1] : vector<8x8xf32> to vector<8xf32>
    %250 = vector.shape_cast %249 : vector<8xf32> to vector<8x1xf32>
    %251 = arith.truncf %248 : vector<8x8xf32> to vector<8x8xbf16>
    %cst_94 = arith.constant dense<0.000000e+00> : vector<8x8xf32>
    %252 = tpu.matmul %251, %236, %cst_94 {dimension_numbers = #tpu.dot_dimension_numbers<[1], [0], [0], [1], [0, 0, 1, 1], [], []>} : vector<8x8xbf16>, vector<8x8xbf16>, vector<8x8xf32> -> vector<8x8xf32>
    %253 = vector.broadcast %250 : vector<8x1xf32> to vector<8x8xf32>
    %254 = arith.divf %252, %253 : vector<8x8xf32>
    %255 = arith.truncf %254 : vector<8x8xf32> to vector<8x8xbf16>
    %256 = vector.extract_strided_slice %62 {offsets = [16, 0], sizes = [8, 32], strides = [1, 1]} : vector<32x32xbf16> to vector<8x32xbf16>
    %cst_95 = arith.constant dense<0.000000e+00> : vector<8x32xf32>
    %257 = tpu.matmul %255, %256, %cst_95 {dimension_numbers = #tpu.dot_dimension_numbers<[1], [0], [0], [1], [0, 0, 1, 1], [], []>} : vector<8x8xbf16>, vector<8x32xbf16>, vector<8x32xf32> -> vector<8x32xf32>
    %258 = arith.addf %232, %257 : vector<8x32xf32>
    %259 = vector.extract_strided_slice %176 {offsets = [0, 24], sizes = [8, 8], strides = [1, 1]} : vector<8x32xbf16> to vector<8x8xbf16>
    %260 = vector.extract_strided_slice %177 {offsets = [0, 24], sizes = [8, 8], strides = [1, 1]} : vector<8x32xbf16> to vector<8x8xbf16>
    %261 = vector.extract_strided_slice %178 {offsets = [0, 24], sizes = [8, 8], strides = [1, 1]} : vector<8x64xbf16> to vector<8x8xbf16>
    %262 = vector.extract_strided_slice %178 {offsets = [0, 56], sizes = [8, 8], strides = [1, 1]} : vector<8x64xbf16> to vector<8x8xbf16>
    %cst_96 = arith.constant dense<0.000000e+00> : vector<8x8xf32>
    %263 = tpu.matmul %259, %261, %cst_96 {dimension_numbers = #tpu.dot_dimension_numbers<[1], [1], [0], [0], [0, 0, 1, 0], [], []>} : vector<8x8xbf16>, vector<8x8xbf16>, vector<8x8xf32> -> vector<8x8xf32>
    %cst_97 = arith.constant dense<0.000000e+00> : vector<8x8xf32>
    %264 = tpu.matmul %260, %179, %cst_97 {dimension_numbers = #tpu.dot_dimension_numbers<[1], [1], [0], [0], [0, 0, 1, 0], [], []>} : vector<8x8xbf16>, vector<8x8xbf16>, vector<8x8xf32> -> vector<8x8xf32>
    %265 = arith.addf %263, %264 : vector<8x8xf32>
    %cst_98 = arith.constant 2.500000e-01 : f32
    %266 = vector.broadcast %cst_98 : f32 to vector<8x8xf32>
    %267 = arith.mulf %265, %266 : vector<8x8xf32>
    %cst_99 = arith.constant -1.000000e+30 : f32
    %268 = vector.broadcast %cst_99 : f32 to vector<8x8xf32>
    %269 = arith.select %65, %267, %268 : vector<8x8xi1>, vector<8x8xf32>
    %cst_100 = arith.constant dense<0xFF800000> : vector<8xf32>
    %270 = vector.multi_reduction <maximumf>, %269, %cst_100 [1] : vector<8x8xf32> to vector<8xf32>
    %271 = vector.shape_cast %270 : vector<8xf32> to vector<8x1xf32>
    %272 = vector.broadcast %271 : vector<8x1xf32> to vector<8x8xf32>
    %273 = arith.subf %269, %272 : vector<8x8xf32>
    %274 = math.exp %273 : vector<8x8xf32>
    %cst_101 = arith.constant dense<0.000000e+00> : vector<8xf32>
    %275 = vector.multi_reduction <add>, %274, %cst_101 [1] : vector<8x8xf32> to vector<8xf32>
    %276 = vector.shape_cast %275 : vector<8xf32> to vector<8x1xf32>
    %277 = arith.truncf %274 : vector<8x8xf32> to vector<8x8xbf16>
    %cst_102 = arith.constant dense<0.000000e+00> : vector<8x8xf32>
    %278 = tpu.matmul %277, %262, %cst_102 {dimension_numbers = #tpu.dot_dimension_numbers<[1], [0], [0], [1], [0, 0, 1, 1], [], []>} : vector<8x8xbf16>, vector<8x8xbf16>, vector<8x8xf32> -> vector<8x8xf32>
    %279 = vector.broadcast %276 : vector<8x1xf32> to vector<8x8xf32>
    %280 = arith.divf %278, %279 : vector<8x8xf32>
    %281 = arith.truncf %280 : vector<8x8xf32> to vector<8x8xbf16>
    %282 = vector.extract_strided_slice %62 {offsets = [24, 0], sizes = [8, 32], strides = [1, 1]} : vector<32x32xbf16> to vector<8x32xbf16>
    %cst_103 = arith.constant dense<0.000000e+00> : vector<8x32xf32>
    %283 = tpu.matmul %281, %282, %cst_103 {dimension_numbers = #tpu.dot_dimension_numbers<[1], [0], [0], [1], [0, 0, 1, 1], [], []>} : vector<8x8xbf16>, vector<8x32xbf16>, vector<8x32xf32> -> vector<8x32xf32>
    %284 = arith.addf %258, %283 : vector<8x32xf32>
    %c8 = arith.constant 8 : index
    %c0_104 = arith.constant 0 : index
    %285 = vector.load %arg23[%c8, %c0_104] : memref<16x32xf32, #tpu.memory_space<vmem>>, vector<8x32xf32>
    tpu.vector_store %arg23[%c8, %c0_104], %284 {strides = array<i32>} : memref<16x32xf32, #tpu.memory_space<vmem>>, vector<8x32xf32>,
    %c0_105 = arith.constant 0 : index
    %c0_106 = arith.constant 0 : index
    %286 = vector.load %arg23[%c0_105, %c0_106] : memref<16x32xf32, #tpu.memory_space<vmem>>, vector<16x32xf32>
    %287 = arith.addf %3, %286 : vector<16x32xf32>
    %c0_107 = arith.constant 0 : index
    %c0_108 = arith.constant 0 : index
    %c0_109 = arith.constant 0 : index
    %288 = vector.load %arg11[%c0_107, %c0_108, %c0_109] : memref<1x1x32xf32, #tpu.memory_space<vmem>>, vector<1x1x32xf32>
    %289 = vector.shape_cast %288 : vector<1x1x32xf32> to vector<1x32xf32>
    %290 = vector.broadcast %289 : vector<1x32xf32> to vector<16x32xf32>
    %291 = arith.addf %287, %290 : vector<16x32xf32>
    %c0_110 = arith.constant 0 : index
    %c0_111 = arith.constant 0 : index
    %c0_112 = arith.constant 0 : index
    %292 = vector.load %arg12[%c0_110, %c0_111, %c0_112] : memref<1x1x32xf32, #tpu.memory_space<vmem>>, vector<1x1x32xf32>
    %293 = vector.shape_cast %292 : vector<1x1x32xf32> to vector<1x32xf32>
    %294 = arith.mulf %291, %291 : vector<16x32xf32>
    %cst_113 = arith.constant dense<0.000000e+00> : vector<16xf32>
    %295 = vector.multi_reduction <add>, %294, %cst_113 [1] : vector<16x32xf32> to vector<16xf32>
    %296 = vector.shape_cast %295 : vector<16xf32> to vector<16x1xf32>
    %cst_114 = arith.constant 3.200000e+01 : f32
    %297 = vector.broadcast %cst_114 : f32 to vector<16x1xf32>
    %298 = arith.divf %296, %297 : vector<16x1xf32>
    %cst_115 = arith.constant 1.1920929E-7 : f32
    %299 = vector.broadcast %cst_115 : f32 to vector<16x1xf32>
    %300 = arith.addf %298, %299 : vector<16x1xf32>
    %301 = math.rsqrt %300 : vector<16x1xf32>
    %302 = vector.broadcast %301 : vector<16x1xf32> to vector<16x32xf32>
    %303 = arith.mulf %291, %302 : vector<16x32xf32>
    %304 = vector.broadcast %293 : vector<1x32xf32> to vector<16x32xf32>
    %305 = arith.mulf %303, %304 : vector<16x32xf32>
    %c0_116 = arith.constant 0 : index
    %c0_117 = arith.constant 0 : index
    %c0_118 = arith.constant 0 : index
    %306 = vector.load %arg13[%c0_116, %c0_117, %c0_118] : memref<1x32x128xf32, #tpu.memory_space<vmem>>, vector<1x32x128xf32>
    %307 = vector.shape_cast %306 : vector<1x32x128xf32> to vector<32x128xf32>
    %308 = arith.truncf %305 : vector<16x32xf32> to vector<16x32xbf16>
    %309 = arith.truncf %307 : vector<32x128xf32> to vector<32x128xbf16>
    %cst_119 = arith.constant dense<0.000000e+00> : vector<16x128xf32>
    %310 = tpu.matmul %308, %309, %cst_119 {dimension_numbers = #tpu.dot_dimension_numbers<[1], [0], [0], [1], [0, 0, 1, 1], [], []>} : vector<16x32xbf16>, vector<32x128xbf16>, vector<16x128xf32> -> vector<16x128xf32>
    %c0_120 = arith.constant 0 : index
    %c0_121 = arith.constant 0 : index
    %c0_122 = arith.constant 0 : index
    %311 = vector.load %arg14[%c0_120, %c0_121, %c0_122] : memref<1x1x128xf32, #tpu.memory_space<vmem>>, vector<1x1x128xf32>
    %312 = vector.shape_cast %311 : vector<1x1x128xf32> to vector<1x128xf32>
    %313 = vector.broadcast %312 : vector<1x128xf32> to vector<16x128xf32>
    %314 = arith.addf %310, %313 : vector<16x128xf32>
    %315 = arith.mulf %314, %314 : vector<16x128xf32>
    %316 = arith.mulf %314, %315 : vector<16x128xf32>
    %cst_123 = arith.constant 4.471500e-02 : f32
    %317 = vector.broadcast %cst_123 : f32 to vector<16x128xf32>
    %318 = arith.mulf %317, %316 : vector<16x128xf32>
    %319 = arith.addf %314, %318 : vector<16x128xf32>
    %cst_124 = arith.constant 0.797884583 : f32
    %320 = vector.broadcast %cst_124 : f32 to vector<16x128xf32>
    %321 = arith.mulf %320, %319 : vector<16x128xf32>
    %322 = math.tanh %321 : vector<16x128xf32>
    %cst_125 = arith.constant 1.000000e+00 : f32
    %323 = vector.broadcast %cst_125 : f32 to vector<16x128xf32>
    %324 = arith.addf %323, %322 : vector<16x128xf32>
    %cst_126 = arith.constant 5.000000e-01 : f32
    %325 = vector.broadcast %cst_126 : f32 to vector<16x128xf32>
    %326 = arith.mulf %325, %324 : vector<16x128xf32>
    %327 = arith.mulf %314, %326 : vector<16x128xf32>
    %c0_127 = arith.constant 0 : index
    %c0_128 = arith.constant 0 : index
    %c0_129 = arith.constant 0 : index
    %328 = vector.load %arg15[%c0_127, %c0_128, %c0_129] : memref<1x128x32xf32, #tpu.memory_space<vmem>>, vector<1x128x32xf32>
    %329 = vector.shape_cast %328 : vector<1x128x32xf32> to vector<128x32xf32>
    %330 = arith.truncf %327 : vector<16x128xf32> to vector<16x128xbf16>
    %331 = arith.truncf %329 : vector<128x32xf32> to vector<128x32xbf16>
    %cst_130 = arith.constant dense<0.000000e+00> : vector<16x32xf32>
    %332 = tpu.matmul %330, %331, %cst_130 {dimension_numbers = #tpu.dot_dimension_numbers<[1], [0], [0], [1], [0, 0, 1, 1], [], []>} : vector<16x128xbf16>, vector<128x32xbf16>, vector<16x32xf32> -> vector<16x32xf32>
    %333 = arith.addf %291, %332 : vector<16x32xf32>
    %c0_131 = arith.constant 0 : index
    %c0_132 = arith.constant 0 : index
    %c0_133 = arith.constant 0 : index
    %334 = vector.load %arg16[%c0_131, %c0_132, %c0_133] : memref<1x1x32xf32, #tpu.memory_space<vmem>>, vector<1x1x32xf32>
    %335 = vector.shape_cast %334 : vector<1x1x32xf32> to vector<1x32xf32>
    %336 = vector.broadcast %335 : vector<1x32xf32> to vector<16x32xf32>
    %337 = arith.addf %333, %336 : vector<16x32xf32>
    %c0_134 = arith.constant 0 : index
    %c0_135 = arith.constant 0 : index
    %338 = vector.load %arg22[%c0_134, %c0_135] : memref<16x32xf32, #tpu.memory_space<vmem>>, vector<16x32xf32>
    tpu.vector_store %arg22[%c0_134, %c0_135], %337 {strides = array<i32>} : memref<16x32xf32, #tpu.memory_space<vmem>>, vector<16x32xf32>,
    %c1_i32 = arith.constant 1 : i32
    %339 = arith.cmpi eq, %arg0, %c1_i32 : i32
    %340 = arith.extui %339 : i1 to i32
    %c0_i32_136 = arith.constant 0 : i32
    %341 = arith.cmpi ne, %340, %c0_i32_136 : i32
    scf.if %341 {
      %c0_137 = arith.constant 0 : index
      %c0_138 = arith.constant 0 : index
      %342 = vector.load %arg17[%c0_137, %c0_138] : memref<1x32xf32, #tpu.memory_space<vmem>>, vector<1x32xf32>
      %343 = arith.mulf %337, %337 : vector<16x32xf32>
      %cst_139 = arith.constant dense<0.000000e+00> : vector<16xf32>
      %344 = vector.multi_reduction <add>, %343, %cst_139 [1] : vector<16x32xf32> to vector<16xf32>
      %345 = vector.shape_cast %344 : vector<16xf32> to vector<16x1xf32>
      %cst_140 = arith.constant 3.200000e+01 : f32
      %346 = vector.broadcast %cst_140 : f32 to vector<16x1xf32>
      %347 = arith.divf %345, %346 : vector<16x1xf32>
      %cst_141 = arith.constant 1.1920929E-7 : f32
      %348 = vector.broadcast %cst_141 : f32 to vector<16x1xf32>
      %349 = arith.addf %347, %348 : vector<16x1xf32>
      %350 = math.rsqrt %349 : vector<16x1xf32>
      %351 = vector.broadcast %350 : vector<16x1xf32> to vector<16x32xf32>
      %352 = arith.mulf %337, %351 : vector<16x32xf32>
      %353 = vector.broadcast %342 : vector<1x32xf32> to vector<16x32xf32>
      %354 = arith.mulf %352, %353 : vector<16x32xf32>
      %c0_142 = arith.constant 0 : index
      %c0_143 = arith.constant 0 : index
      %355 = vector.load %arg18[%c0_142, %c0_143] : memref<32x64xf32, #tpu.memory_space<vmem>>, vector<32x64xf32>
      %356 = arith.truncf %354 : vector<16x32xf32> to vector<16x32xbf16>
      %357 = arith.truncf %355 : vector<32x64xf32> to vector<32x64xbf16>
      %cst_144 = arith.constant dense<0.000000e+00> : vector<16x64xf32>
      %358 = tpu.matmul %356, %357, %cst_144 {dimension_numbers = #tpu.dot_dimension_numbers<[1], [0], [0], [1], [0, 0, 1, 1], [], []>} : vector<16x32xbf16>, vector<32x64xbf16>, vector<16x64xf32> -> vector<16x64xf32>
      %c0_145 = arith.constant 0 : index
      %c0_146 = arith.constant 0 : index
      %359 = vector.load %arg21[%c0_145, %c0_146] : memref<16x64xf32, #tpu.memory_space<vmem>>, vector<16x64xf32>
      tpu.vector_store %arg21[%c0_145, %c0_146], %358 {strides = array<i32>} : memref<16x64xf32, #tpu.memory_space<vmem>>, vector<16x64xf32>,
    } else {
    }
    return
  }
  func.func @transform_0(%arg0: i32) -> (i32, i32) {
    %c0_i32 = arith.constant 0 : i32
    %c0_i32_0 = arith.constant 0 : i32
    %c0_i32_1 = arith.constant 0 : i32
    return %c0_i32, %c0_i32_0 : i32, i32
  }
  func.func @transform_1(%arg0: i32) -> (i32, i32) {
    %c0_i32 = arith.constant 0 : i32
    %c0_i32_0 = arith.constant 0 : i32
    %c0_i32_1 = arith.constant 0 : i32
    return %c0_i32, %c0_i32_0 : i32, i32
  }
  func.func @transform_2(%arg0: i32) -> (i32, i32) {
    %c0_i32 = arith.constant 0 : i32
    %c0_i32_0 = arith.constant 0 : i32
    %c0_i32_1 = arith.constant 0 : i32
    return %c0_i32, %c0_i32_0 : i32, i32
  }
  func.func @transform_3(%arg0: i32) -> (i32, i32) {
    %c0_i32 = arith.constant 0 : i32
    %c0_i32_0 = arith.constant 0 : i32
    %c0_i32_1 = arith.constant 0 : i32
    return %c0_i32, %c0_i32_0 : i32, i32
  }
  func.func @transform_4(%arg0: i32) -> (i32, i32, i32) {
    %c0_i32 = arith.constant 0 : i32
    %c0_i32_0 = arith.constant 0 : i32
    %c0_i32_1 = arith.constant 0 : i32
    return %arg0, %c0_i32, %c0_i32_0 : i32, i32, i32
  }
  func.func @transform_5(%arg0: i32) -> (i32, i32, i32) {
    %c0_i32 = arith.constant 0 : i32
    %c0_i32_0 = arith.constant 0 : i32
    %c0_i32_1 = arith.constant 0 : i32
    return %arg0, %c0_i32, %c0_i32_0 : i32, i32, i32
  }
  func.func @transform_6(%arg0: i32) -> (i32, i32, i32) {
    %c0_i32 = arith.constant 0 : i32
    %c0_i32_0 = arith.constant 0 : i32
    %c0_i32_1 = arith.constant 0 : i32
    return %arg0, %c0_i32, %c0_i32_0 : i32, i32, i32
  }
  func.func @transform_7(%arg0: i32) -> (i32, i32, i32) {
    %c0_i32 = arith.constant 0 : i32
    %c0_i32_0 = arith.constant 0 : i32
    %c0_i32_1 = arith.constant 0 : i32
    return %arg0, %c0_i32, %c0_i32_0 : i32, i32, i32
  }
  func.func @transform_8(%arg0: i32) -> (i32, i32, i32) {
    %c0_i32 = arith.constant 0 : i32
    %c0_i32_0 = arith.constant 0 : i32
    %c0_i32_1 = arith.constant 0 : i32
    return %arg0, %c0_i32, %c0_i32_0 : i32, i32, i32
  }
  func.func @transform_9(%arg0: i32) -> (i32, i32, i32) {
    %c0_i32 = arith.constant 0 : i32
    %c0_i32_0 = arith.constant 0 : i32
    %c0_i32_1 = arith.constant 0 : i32
    return %arg0, %c0_i32, %c0_i32_0 : i32, i32, i32
  }
  func.func @transform_10(%arg0: i32) -> (i32, i32, i32) {
    %c0_i32 = arith.constant 0 : i32
    %c0_i32_0 = arith.constant 0 : i32
    %c0_i32_1 = arith.constant 0 : i32
    return %arg0, %c0_i32, %c0_i32_0 : i32, i32, i32
  }
  func.func @transform_11(%arg0: i32) -> (i32, i32, i32) {
    %c0_i32 = arith.constant 0 : i32
    %c0_i32_0 = arith.constant 0 : i32
    %c0_i32_1 = arith.constant 0 : i32
    return %arg0, %c0_i32, %c0_i32_0 : i32, i32, i32
  }
  func.func @transform_12(%arg0: i32) -> (i32, i32, i32) {
    %c0_i32 = arith.constant 0 : i32
    %c0_i32_0 = arith.constant 0 : i32
    %c0_i32_1 = arith.constant 0 : i32
    return %arg0, %c0_i32, %c0_i32_0 : i32, i32, i32
  }
  func.func @transform_13(%arg0: i32) -> (i32, i32, i32) {
    %c0_i32 = arith.constant 0 : i32
    %c0_i32_0 = arith.constant 0 : i32
    %c0_i32_1 = arith.constant 0 : i32
    return %arg0, %c0_i32, %c0_i32_0 : i32, i32, i32
  }
  func.func @transform_14(%arg0: i32) -> (i32, i32, i32) {
    %c0_i32 = arith.constant 0 : i32
    %c0_i32_0 = arith.constant 0 : i32
    %c0_i32_1 = arith.constant 0 : i32
    return %arg0, %c0_i32, %c0_i32_0 : i32, i32, i32
  }
  func.func @transform_15(%arg0: i32) -> (i32, i32, i32) {
    %c0_i32 = arith.constant 0 : i32
    %c0_i32_0 = arith.constant 0 : i32
    %c0_i32_1 = arith.constant 0 : i32
    return %arg0, %c0_i32, %c0_i32_0 : i32, i32, i32
  }
  func.func @transform_16(%arg0: i32) -> (i32, i32) {
    %c0_i32 = arith.constant 0 : i32
    %c0_i32_0 = arith.constant 0 : i32
    %c0_i32_1 = arith.constant 0 : i32
    return %c0_i32, %c0_i32_0 : i32, i32
  }
  func.func @transform_17(%arg0: i32) -> (i32, i32) {
    %c0_i32 = arith.constant 0 : i32
    %c0_i32_0 = arith.constant 0 : i32
    %c0_i32_1 = arith.constant 0 : i32
    return %c0_i32, %c0_i32_0 : i32, i32
  }
  func.func @transform_18(%arg0: i32) -> (i32, i32, i32) {
    %c0_i32 = arith.constant 0 : i32
    %c0_i32_0 = arith.constant 0 : i32
    %c0_i32_1 = arith.constant 0 : i32
    return %arg0, %c0_i32, %c0_i32_0 : i32, i32, i32
  }
  func.func @transform_19(%arg0: i32) -> (i32, i32, i32) {
    %c0_i32 = arith.constant 0 : i32
    %c0_i32_0 = arith.constant 0 : i32
    %c0_i32_1 = arith.constant 0 : i32
    return %arg0, %c0_i32, %c0_i32_0 : i32, i32, i32
  }
  func.func @transform_20(%arg0: i32) -> (i32, i32) {
    %c0_i32 = arith.constant 0 : i32
    %c0_i32_0 = arith.constant 0 : i32
    %c0_i32_1 = arith.constant 0 : i32
    return %c0_i32, %c0_i32_0 : i32, i32
  }
}

</mosaic_0001>

<bundles_post_ra>
// kernel: tile.19
= control target key start
LH: loop header
LB: loop body
LE: loop exit
PB: predicated region body
PF: predicated region fallthrough
CT: control target
= control target key end

     0   :  { %vm36_vm0 = vcmask 1047556   ;;  %s81_s22 = smov 8   ;;  %s82_s23 = smov 16   ;;  %vm38_vm1 = vcmask 64512   ;;  %vm48_vm2 = vcmask 261312   ;;  %vm58_vm3 = vcmask 195712   ;;  %s133_s0 = inlined_call_operand.vmem [shape: f32[8,4,8], index: 0, kind: input, shape index: {}]   ;;  %s134_s1 = inlined_call_operand.vmem [shape: f32[8,32], index: 1, kind: output, shape index: {}]  }
   0x1   :  { %v70_v0 = vld [vmem:[%s133_s0 + $0x1c] sm:$0xf]  ;;  %v71_v1 = vld [vmem:[%s133_s0 + $0x18] sm:$0xf]  ;;  %v72_v2 = vld [vmem:[%s133_s0 + $0x14] sm:$0xf] }
   0x2   :  { %7 = vst [vmem:[#allocation0 + $0x38] sm:$0xf] %v70_v0  ;;  %v73_v3 = vld [vmem:[%s133_s0 + $0x10] sm:$0xf]  ;;  %v74_v4 = vld [vmem:[%s133_s0 + $0xc] sm:$0xf] }
   0x3   :  { %11 = vst [vmem:[#allocation0 + $0x30] sm:$0xf] %v71_v1  ;;  %v75_v5 = vld [vmem:[%s133_s0 + $0x8] sm:$0xf]  ;;  %v76_v6 = vld [vmem:[%s133_s0 + $0x4] sm:$0xf] }
   0x4   :  { %15 = vst [vmem:[#allocation0 + $0x28] sm:$0xf] %v72_v2  ;;  %v32_v7 = vld [vmem:[%s133_s0] sm:$0xf]  ;;  %s80_s0 = smov 24   ;;  %vm68_vm4 = vcmask 130112  }
   0x5   :  { %19 = vst [vmem:[#allocation0 + $0x20] sm:$0xf] %v73_v3 }
   0x6   :  { %23 = vst [vmem:[#allocation0 + $0x18] sm:$0xf] %v74_v4 }
   0x7   :  { %27 = vst [vmem:[#allocation0 + $0x10] sm:$0xf] %v75_v5 }
   0x8   :  { %31 = vst [vmem:[#allocation0 + $0x8] sm:$0xf] %v76_v6 }
   0x9   :  { %33 = vst [vmem:[#allocation0] sm:$0xf] %v32_v7 }
   0xc   :  { %v43_v8 = vld [vmem:[#allocation0 + $0x3] ss:$8 sm:$0xf0]   ;;  %v63_v9 = vld [vmem:[#allocation0 + $0x1] ss:$8 sm:$0xf0]  }
   0xd   :  { %v53_v15 = vld [vmem:[#allocation0 + $0x2] ss:$8 sm:$0xf0]   ;;  %v35_v18 = vld [vmem:[#allocation0] ss:$8 sm:$0xf0]  }
  0x10   :  { %v41_v10 = vld [vmem:[#allocation0 + $0x3] ss:$8 sm:$0xf]   ;;  %v61_v12 = vld [vmem:[#allocation0 + $0x1] ss:$8 sm:$0xf]  }
  0x11   :  { %v45_v11 = vsel %vm36_vm0, %v43_v8, %v41_v10  ;;  %v65_v13 = vsel %vm36_vm0, %v63_v9, %v61_v12  ;;  %v51_v14 = vld [vmem:[#allocation0 + $0x2] ss:$8 sm:$0xf]   ;;  %v34_v17 = vld [vmem:[#allocation0] ss:$8 sm:$0xf]  }
  0x12   :  { %46 = vrot.lane.b32.xlu0 %v45_v11, %s80_s0  ;;  %66 = vrot.lane.b32.xlu1 %v65_v13, %s81_s22  ;;  %v55_v16 = vsel %vm36_vm0, %v53_v15, %v51_v14  ;;  %v37_v19 = vsel %vm36_vm0, %v35_v18, %v34_v17 }
  0x13   :  { %39 = vst.msk [vmem:[%s134_s1] sm:$0xff] %vm38_vm1, %v37_v19  }
  0x1a   :  { %56 = vrot.lane.b32.xlu0 %v55_v16, %s82_s23 }
  0x84   :  { %v47_v20 = vpop.permute.xlu0 %46   ;;  %v67_v21 = vpop.permute.xlu1 %66  }
  0x85   :  { %49 = vst.msk [vmem:[%s134_s1] sm:$0xff] %vm48_vm2, %v47_v20  }
  0x8c   :  { %v57_v22 = vpop.permute.xlu0 %56  }
  0x8d   :  { %59 = vst.msk [vmem:[%s134_s1] sm:$0xff] %vm58_vm3, %v57_v22  }
  0x8e   :  { %69 = vst.msk [vmem:[%s134_s1] sm:$0xff] %vm68_vm4, %v67_v21  }

// kernel: transformer_forward.1
= control target key start
LH: loop header
LB: loop body
LE: loop exit
PB: predicated region body
PF: predicated region fallthrough
CT: control target
= control target key end

     0   :  { %s3118_s0 = inlined_call_operand.vmem [shape: f32[16,32], index: 0, kind: input, shape index: {}]   ;;  %s3119_s1 = inlined_call_operand.vmem [shape: f32[16,128], index: 1, kind: input, shape index: {}]   ;;  %s3120_s2 = inlined_call_operand.vmem [shape: f32[16,128], index: 2, kind: input, shape index: {}]   ;;  %s3121_s3 = inlined_call_operand.vmem [shape: f32[16,128], index: 3, kind: input, shape index: {}]   ;;  %s3122_s4 = inlined_call_operand.vmem [shape: f32[2,1,32], index: 4, kind: input, shape index: {}]   ;;  %s3123_s5 = inlined_call_operand.vmem [shape: f32[2,32,128], index: 5, kind: input, shape index: {}]   ;;  %s3124_s6 = inlined_call_operand.vmem [shape: f32[2,1,128], index: 6, kind: input, shape index: {}]   ;;  %s3125_s7 = inlined_call_operand.vmem [shape: f32[2,16,64], index: 7, kind: input, shape index: {}]   ;;  %s3126_s8 = inlined_call_operand.vmem [shape: f32[2,1,64], index: 8, kind: input, shape index: {}]   ;;  %s3127_s9 = inlined_call_operand.vmem [shape: f32[2,32,32], index: 9, kind: input, shape index: {}]   ;;  %s3128_s10 = inlined_call_operand.vmem [shape: f32[2,1,32], index: 10, kind: input, shape index: {}]   ;;  %s3129_s11 = inlined_call_operand.vmem [shape: f32[2,1,32], index: 11, kind: input, shape index: {}]   ;;  %s3130_s12 = inlined_call_operand.vmem [shape: f32[2,32,128], index: 12, kind: input, shape index: {}]   ;;  %s3131_s13 = inlined_call_operand.vmem [shape: f32[2,1,128], index: 13, kind: input, shape index: {}]   ;;  %s3132_s14 = inlined_call_operand.vmem [shape: f32[2,128,32], index: 14, kind: input, shape index: {}]   ;;  %s3133_s15 = inlined_call_operand.vmem [shape: f32[2,1,32], index: 15, kind: input, shape index: {}]   ;;  %s3134_s16 = inlined_call_operand.vmem [shape: f32[1,32], index: 16, kind: input, shape index: {}]   ;;  %s3135_s17 = inlined_call_operand.vmem [shape: f32[32,64], index: 17, kind: input, shape index: {}]   ;;  %s3136_s18 = inlined_call_operand.vmem [shape: f32[2,16,16], index: 18, kind: output, shape index: {0}]   ;;  %s3137_s19 = inlined_call_operand.vmem [shape: f32[2,16,8], index: 19, kind: output, shape index: {1}]   ;;  %s3138_s20 = inlined_call_operand.hbm [shape: f32[16,64], index: 20, kind: output, shape index: {2}]  }
   0x1   :  { %3146 = sst [smem:[#allocation9_spill]] %s3118_s0 }
   0x2   :  { %3147 = sst [smem:[#allocation10_spill]] %s3119_s1 }
   0x3   :  { %3148 = sst [smem:[#allocation11_spill]] %s3120_s2 }
   0x4   :  { %3149 = sst [smem:[#allocation12_spill]] %s3121_s3 }
   0x5   :  { %3150 = sst [smem:[#allocation13_spill]] %s3122_s4 }
   0x6   :  { %3151 = sst [smem:[#allocation14_spill]] %s3123_s5 }
   0x7   :  { %3152 = sst [smem:[#allocation15_spill]] %s3124_s6 }
   0x8   :  { %3153 = sst [smem:[#allocation16_spill]] %s3125_s7 }
   0x9   :  { %3154 = sst [smem:[#allocation17_spill]] %s3127_s9 }
   0xa   :  { %3155 = sst [smem:[#allocation18_spill]] %s3134_s16 }
   0xb   :  { %3156 = sst [smem:[#allocation19_spill]] %s3135_s17 }
   0xc   :  { %3157 = sst [smem:[#allocation20_spill]] %s3138_s20 }
   0xd   :  { %26 = vsyncpa [#allocation5], 0  ;;  %s2636_s1 = smov 0  }
   0xe LB: > { %3158 = sst [smem:[#allocation7_spill]] %s2514_s1  ;;  %s2642_s22 = sadd.s32 4294967295, %s2514_s1   ;;  %s2514_s1 = sphi %s2636_s1, %s32_s1  }
   0xf   : > { %p2324_p0 = scmp.ge.s32.totalorder %s2514_s1, 1  ;;  %p659_p1 = scmp.lt.s32.totalorder %s2514_s1, 3 }
  0x11   : > { %p660_p2 = pnand %p2324_p0, %p659_p1 }
  0x13   : > { %663 = sbr.rel (%p660_p2) target bundleno = 3154 (0xc52), region = 92 }
  0x18   : > { %p763_p3 = scmp.lt.s32.totalorder %s2642_s22, 1  ;;  %s3160_s5 = sld [smem:[#allocation14_spill]] }
  0x19   : > { %s3162_s7 = sld [smem:[#allocation16_spill]]  ;;  %p2339_p4 = scmp.ne.s32.totalorder %s2642_s22, 0 }
  0x1a   : > { %s2648_s23 = scalar_select %p763_p3, %s2642_s22, 1 }
  0x1b   : > { %s3163_s9 = sld [smem:[#allocation17_spill]] }
  0x1c   : > { %s2381_s26 = sshll.u32 %s2648_s23, 5  ;;  %s2382_s21 = sshll.u32 %s2648_s23, 4 }
  0x1d   : > { %s792_s6 = scalar_lea.vmem %s3129_s11, %s2648_s23  ;;  %s2690_s1 = scalar_lea.vmem %s3130_s12, %s2381_s26 }
  0x1e   : > { %s2658_s4 = scalar_lea.vmem %s3160_s5, %s2381_s26  ;;  %s2385_s3 = sshll.u32 %s2648_s23, 7 }
  0x1f   : > { %s2672_s17 = scalar_lea.vmem %s3162_s7, %s2382_s21  ;;  %s800_s7 = scalar_lea.vmem %s3131_s13, %s2648_s23 }
  0x20   : > { %s2704_s29 = scalar_lea.vmem %s3132_s14, %s2385_s3  ;;  %s2709_s24 = scalar_lea.vmem %s3136_s18, %s2382_s21 }
  0x21   : > { %s2677_s27 = scalar_lea.vmem %s3163_s9, %s2381_s26  ;;  %s2714_s16 = scalar_lea.vmem %s3137_s19, %s2382_s21 }
  0x22   : > { %3164 = sst [smem:[#allocation8_spill]] %s2677_s27  ;;  %823 = sbr.rel (%p2339_p4) target bundleno = 44 (0x2c), region = 96 }
  0x23   : > { %s3165_s25 = sld [smem:[#allocation9_spill]] (!%p2339_p4) }
  0x27   : > { %vm826_vm0 = vcmask 261120  }
  0x29   : > { %v824_v0 = vld [vmem:[%s3165_s25] sm:$0xff]  ;;  %v825_v1 = vld [vmem:[%s3165_s25 + $0x8] sm:$0xff] }
  0x2a   : > { %827 = vst.msk [vmem:[#allocation2] sm:$0xff] %vm826_vm0, %v824_v0 }
  0x2b   : > { %828 = vst.msk [vmem:[#allocation2 + $0x8] sm:$0xff] %vm826_vm0, %v825_v1 }
  0x2c PF: > { %vm834_vm1 = vcmask 261120   ;;  %v2516_v8 = vmov 32.0   ;;  %v881_v14 = vld [vmem:[%s2658_s4 + $0x10] sm:$0xff]  ;;  %v882_v15 = vld [vmem:[%s2658_s4 + $0x18] sm:$0xff]  ;;  %v879_v18 = vld [vmem:[%s2658_s4] sm:$0xff]  ;;  %s3166_s28 = sld [smem:[#allocation13_spill]] }
  0x2d   : > { %2424 = vrcp.f32 %v2516_v8  ;;  %v885_v16 = vpack.c.bf16 %v882_v15, %v881_v14  ;;  %v880_v19 = vld [vmem:[%s2658_s4 + $0x8] sm:$0xff]  ;;  %s3168_s2 = sld [smem:[#allocation15_spill]]  ;;  %s2517_s20 = smov 4   ;;  %vm948_vm9 = vcmask 64512   ;;  %vm939_vm10 = vcmask 130048  }
  0x2e   : > { %v884_v20 = vpack.c.bf16 %v880_v19, %v879_v18  ;;  %s2518_s3 = smov 124   ;;  %s3170_s21 = sld [smem:[#allocation10_spill]]  ;;  %v952_v14 = vld [vmem:[%s2672_s17 + $0x8] sm:$0xff]  ;;  %vm1061_vm11 = vcmask 1043456  }
  0x2f   : > { %899 = vmatpush.bf16.msra.mxu0 %v885_v16  ;;  %s3171_s30 = sld [smem:[#allocation11_spill]]  ;;  %s2519_s26 = smov 96  }
  0x30   : > { %s2525_s5 = smov 104   ;;  %s2526_s4 = smov 112  }
  0x31   : > { %v2723_v2 = vld [vmem:[#allocation2] sm:$0xff]  ;;  %s3176_s27 = sld [smem:[#allocation8_spill]]  ;;  %p2375_p5 = scmp.ne.s32.totalorder %s2642_s22, 1 }
  0x32   : > { %v830_v3 = vld [vmem:[#allocation2 + $0x8] sm:$0xff]  ;;  %v832_v4 = vmul.f32 %v2723_v2, %v2723_v2  ;;  %s3167_s0 = scalar_lea.vmem %s3166_s28, %s2648_s23  ;;  %s3173_s28 = scalar_lea.vmem %s3126_s8, %s2648_s23 }
  0x33   : > { %v833_v6 = vmul.f32 %v830_v3, %v830_v3  ;;  %v2425_v9 = vpop.eup %2424  ;;  %900 = vmatpush.bf16.msra.mxu0 %v884_v20  ;;  %v2417_v41 = vld [vmem:[%s3167_s0] ss:$0 sm:$0xff]  ;;  %s3169_s9 = scalar_lea.vmem %s3168_s2, %s2648_s23  ;;  %s2520_s2 = smov 48  }
  0x34   : > { %v835_v5 = vsel %vm834_vm1, %v832_v4, 0.0  ;;  %v842_v10 = vmul.f32 32.0, %v2425_v9  ;;  %vm846_vm2 = vweird.f32 %v2425_v9  ;;  %v2418_v47 = vld [vmem:[%s3169_s9] ss:$0 sm:$0xff]  ;;  %s3172_s9 = sld [smem:[#allocation12_spill]]  ;;  %v908_v62 = vld [vmem:[%s3170_s21 + $0x8] sm:$0xff] }
  0x35   : > { %836 = vadd.xlane.f32.xlu0 %v835_v5  ;;  %v838_v7 = vsel %vm834_vm1, %v833_v6, 0.0  ;;  %v907_v53 = vld [vmem:[%s3170_s21] sm:$0xff]  ;;  %v916_v63 = vld [vmem:[%s3171_s30 + $0x8] sm:$0xff]  ;;  %s2524_s0 = smov 80  }
  0x36   : > { %v843_v11 = vsub.f32 1.0, %v842_v10  ;;  %v915_v54 = vld [vmem:[%s3171_s30] sm:$0xff] }
  0x38   : > { %v844_v12 = vmul.f32 %v2425_v9, %v843_v11 }
  0x3a   : > { %v845_v13 = vadd.f32 %v2425_v9, %v844_v12  ;;  %v925_v55 = vld [vmem:[%s3172_s9] sm:$0xff]  ;;  %v926_v1 = vld [vmem:[%s3172_s9 + $0x8] sm:$0xff] }
  0x3c   : > { %v2731_v17 = vsel %vm846_vm2, %v2425_v9, %v845_v13  ;;  %v951_v13 = vld [vmem:[%s2672_s17] sm:$0xff]  ;;  %s2523_s17 = smov 88  }
  0x3d   : > { %839 = vadd.xlane.f32.xlu0 %v838_v7  ;;  %v953_v15 = vpack.c.bf16 %v952_v14, %v951_v13 }
  0x3f   : > { %972 = vmatpush.bf16.msra.mxu1 %v953_v15 }
  0xa8   : > { %v837_v21 = vpop.xlane.xlu0 %836 }
  0xa9   : > { %v848_v22 = vmul.f32 %v2731_v17, %v837_v21  ;;  %v2789_v21 = vld [vmem:[%s3173_s28] ss:$0 sm:$0xff]  ;;  %s2527_s28 = smov 72  }
  0xab   : > { %v850_v23 = vadd.f32 1.1920929e-07, %v848_v22 }
  0xad   : > { %2426 = vrsqrt.f32 %v850_v23  ;;  %vm858_vm4 = vweird.f32 %v850_v23 }
  0xb0   : > { %v840_v24 = vpop.xlane.xlu0 %839 }
  0xb1   : > { %v849_v25 = vmul.f32 %v2731_v17, %v840_v24 }
  0xb3   : > { %v2427_v26 = vpop.eup %2426  ;;  %v851_v27 = vadd.f32 1.1920929e-07, %v849_v25 }
  0xb4   : > { %v853_v28 = vmul.f32 %v2427_v26, %v850_v23  ;;  %vm859_vm3 = vweird.f32 %v2427_v26 }
  0xb5   : > { %2428 = vrsqrt.f32 %v851_v27  ;;  %vm860_vm5 = vmor %vm858_vm4, %vm859_vm3  ;;  %vm868_vm7 = vweird.f32 %v851_v27 }
  0xb6   : > { %v854_v29 = vmul.f32 %v2427_v26, %v853_v28 }
  0xb8   : > { %v855_v30 = vmul.f32 0.5, %v854_v29 }
  0xba   : > { %v856_v31 = vsub.f32 1.5, %v855_v30 }
  0xbb   : > { %v2429_v32 = vpop.eup %2428 }
  0xbc   : > { %v863_v33 = vmul.f32 %v2429_v32, %v851_v27  ;;  %v857_v34 = vmul.f32 %v2427_v26, %v856_v31  ;;  %vm869_vm6 = vweird.f32 %v2429_v32 }
  0xbd   : > { %vm870_vm8 = vmor %vm868_vm7, %vm869_vm6 }
  0xbe   : > { %v864_v35 = vmul.f32 %v2429_v32, %v863_v33  ;;  %v861_v37 = vsel %vm860_vm5, %v2427_v26, %v857_v34 }
  0xbf   : > { %v872_v40 = vmul.f32 %v861_v37, %v2723_v2  ;;  %v991_v37 = vlaneseq }
  0xc0   : > { %v865_v36 = vmul.f32 0.5, %v864_v35 }
  0xc1   : > { %v877_v44 = vmul.f32 %v2417_v41, %v872_v40 }
  0xc2   : > { %v866_v38 = vsub.f32 1.5, %v865_v36 }
  0xc4   : > { %v867_v39 = vmul.f32 %v2429_v32, %v866_v38  ;;  %v992_v38 = vshrl.u32 %v991_v37, 7 }
  0xc6   : > { %v871_v42 = vsel %vm870_vm8, %v2429_v32, %v867_v39  ;;  %v994_v39 = vand.u32 127, %v991_v37 }
  0xc7   : > { %v873_v43 = vmul.f32 %v871_v42, %v830_v3 }
  0xc8   : > { %vm2814_vm12 = vcmp.le.s32.totalorder %v994_v39, %v992_v38  ;;  %v983_v39 = vld [vmem:[%s3176_s27] sm:$0xff] }
  0xc9   : > { %v878_v45 = vmul.f32 %v2417_v41, %v873_v43 }
  0xcb   : > { %v883_v46 = vpack.c.bf16 %v878_v45, %v877_v44 }
  0xcd   : > { %2340 = vmatmul.msk.bf16.vlgmr.msra.gmra.mxu0 %vm834_vm1, %v883_v46 }
 0x14a   : > { %v902_v48 = vpop.f32.mrf.mxu0 }
 0x14b   : > { %v903_v49 = vadd.f32 %v2418_v47, %v902_v48 }
 0x14d   : > { %921 = vrot.lane.b32.xlu2 %v903_v49, %s2517_s20  ;;  %911 = vrot.lane.b32.xlu1 %v903_v49, %s2518_s3  ;;  %v909_v57 = vmul.f32 %v907_v53, %v903_v49 }
 0x152   : > { %v904_v50 = vpop.f32.mrf.mxu0 }
 0x153   : > { %v905_v51 = vadd.f32 %v2418_v47, %v904_v50 }
 0x155   : > { %923 = vrot.lane.b32.xlu2 %v905_v51, %s2517_s20  ;;  %913 = vrot.lane.b32.xlu1 %v905_v51, %s2518_s3  ;;  %v910_v6 = vmul.f32 %v908_v62, %v905_v51  ;;  %s2521_s20 = smov 64   ;;  %s2522_s3 = smov 120  }
 0x1a7   : > { %v922_v52 = vpop.permute.xlu2 %921 }
 0x1a8   : > { %v927_v59 = vmul.f32 %v925_v55, %v922_v52 }
 0x1af   : > { %v924_v3 = vpop.permute.xlu2 %923 }
 0x1b0   : > { %v928_v8 = vmul.f32 %v926_v1, %v924_v3 }
 0x1bf   : > { %v912_v56 = vpop.permute.xlu1 %911 }
 0x1c0   : > { %v917_v58 = vmul.f32 %v915_v54, %v912_v56 }
 0x1c2   : > { %v919_v60 = vadd.f32 %v917_v58, %v909_v57 }
 0x1c4   : > { %v2758_v61 = vadd.f32 %v927_v59, %v919_v60 }
 0x1c6   : > { %v981_v0 = vpack.c.bf16 %v2758_v61, %v2758_v61 }
 0x1c7   : > { %v914_v4 = vpop.permute.xlu1 %913 }
 0x1c8   : > { %v997_v5 = vunpack.c.l.b16 %v981_v0  ;;  %v918_v7 = vmul.f32 %v916_v63, %v914_v4 }
 0x1ca   : > { %v998_v9 = vpack.c.b16 %v997_v5, %v997_v5  ;;  %v920_v10 = vadd.f32 %v918_v7, %v910_v6 }
 0x1cc   : > { %v2771_v11 = vadd.f32 %v928_v8, %v920_v10  ;;  %999 = vrot.lane.b32.xlu2 %v998_v9, %s2519_s26  ;;  %1001 = vrot.lane.b32.xlu1 %v998_v9, %s2520_s2 }
 0x1ce   : > { %v955_v12 = vpack.c.bf16 %v2771_v11, %v2758_v61 }
 0x1d0   : > { %960 = vrot.lane.b32.xlu0 %v955_v12, %s2521_s20  ;;  %v982_v12 = vpack.c.bf16 %v2771_v11, %v2771_v11 }
 0x1d2   : > { %v1444_v13 = vunpack.c.l.b16 %v982_v12 }
 0x1d4   : > { %1112 = vrot.lane.b32.xlu2 %v998_v9, %s2522_s3  ;;  %v2846_v14 = vpack.c.b16 %v1444_v13, %v1444_v13 }
 0x226   : > { %v1000_v20 = vpop.permute.xlu2 %999 }
 0x22e   : > { %v1113_v35 = vpop.permute.xlu2 %1112 }
 0x23e   : > { %v1002_v16 = vpop.permute.xlu1 %1001 }
 0x23f   : > { %v1007_v18 = vsel %vm948_vm9, %v1002_v16, 0 }
 0x240   : > { %1016 = vmatpush.bf16.xpose.msra.mxu2 %v1007_v18  ;;  %1106 = vmatpush.bf16.xpose.msrb.mxu0 %v1007_v18 }
 0x242   : > { %v961_v19 = vpop.permute.xlu0 %960 }
 0x243   : > { %2341 = vmatmul.msk.bf16.vlgmr.msra.gmra.mxu1 %vm939_vm10, %v961_v19 }
 0x247   : > { %2342 = vmatmul.msk.bf16.vlgmr.msra.gmra.mxu2 %vm948_vm9, %v1000_v20 }
 0x2c0   : > { %v974_v22 = vpop.f32.mrf.mxu1 }
 0x2c1   : > { %v975_v23 = vadd.f32 %v2789_v21, %v974_v22 }
 0x2c3   : > { %v979_v24 = vpack.c.bf16 %v975_v23, %v975_v23 }
 0x2c5   : > { %v1054_v25 = vunpack.c.l.b16 %v979_v24  ;;  %v1026_v26 = vsel %vm948_vm9, %v979_v24, 0 }
 0x2c6   : > { %1035 = vmatpush.bf16.xpose.msrb.mxu1 %v1026_v26 }
 0x2c7   : > { %v2793_v27 = vpack.c.b16 %v1054_v25, %v1054_v25 }
 0x2c8   : > { %v976_v34 = vpop.f32.mrf.mxu1 }
 0x2c9   : > { %1147 = vrot.lane.b32.xlu0 %v2793_v27, %s2523_s17  ;;  %1114 = vrot.lane.b32.xlu1 %v2793_v27, %s2522_s3  ;;  %v977_v4 = vadd.f32 %v2789_v21, %v976_v34 }
 0x2ca   : > { %v1018_v28 = vpop.f32.mrf.mxu2 }
 0x2cb   : > { %v980_v6 = vpack.c.bf16 %v977_v4, %v977_v4 }
 0x2cd   : > { %2343 = vmatmul.msk.bf16.vlgmr.msrb.gmra.mxu1 %vm948_vm9, %v981_v0  ;;  %v1501_v7 = vunpack.c.l.b16 %v980_v6  ;;  %v1473_v34 = vsel %vm948_vm9, %v980_v6, 0 }
 0x2d1   : > { %1222 = vrot.lane.b32.xlu0 %v998_v9, %s2524_s0  ;;  %1094 = vrot.lane.b32.xlu1 %v998_v9, %s2523_s17 }
 0x2d2   : > { %v1020_v29 = vpop.f32.mrf.mxu2 }
 0x2d9   : > { %1352 = vrot.lane.b32.xlu0 %v2793_v27, %s2525_s5  ;;  %1242 = vrot.lane.b32.xlu1 %v2793_v27, %s2526_s4 }
 0x2e1   : > { %1350 = vrot.lane.b32.xlu0 %v998_v9, %s2525_s5  ;;  %1240 = vrot.lane.b32.xlu1 %v998_v9, %s2526_s4 }
 0x2e9   : > { %1332 = vrot.lane.b32.xlu1 %v998_v9, %s2527_s28  ;;  %v2838_v9 = vpack.c.b16 %v1501_v7, %v1501_v7 }
 0x33b   : > { %v1148_v30 = vpop.permute.xlu0 %1147  ;;  %v1115_v31 = vpop.permute.xlu1 %1114 }
 0x33c   : > { %v1120_v32 = vsel %vm948_vm9, %v1115_v31, 0  ;;  %v1153_v33 = vsel %vm1061_vm11, %v1148_v30, 0 }
 0x33d   : > { %1129 = vmatpush.bf16.xpose.msrb.mxu2 %v1120_v32  ;;  %1162 = vmatpush.bf16.msra.mxu3 %v1153_v33 }
 0x343   : > { %v1095_v36 = vpop.permute.xlu1 %1094  ;;  %v1223_v49 = vpop.permute.xlu0 %1222 }
 0x344   : > { %2345 = vmatmul.msk.bf16.vlgmr.msrb.gmra.mxu0 %vm948_vm9, %v1095_v36  ;;  %2346 = vmatmul.msk.bf16.vlgmr.msrb.gmra.mxu2 %vm948_vm9, %v1113_v35 }
 0x345   : > { %1234 = vmatpush.bf16.xpose.msra.mxu2 %v1007_v18 }
 0x34a   : > { %v1037_v40 = vpop.f32.mrf.mxu1 }
 0x34b   : > { %v1038_v41 = vadd.f32 %v1037_v40, %v1018_v28  ;;  %v1243_v42 = vpop.permute.xlu1 %1242  ;;  %v1353_v26 = vpop.permute.xlu0 %1352  ;;  %v987_v40 = vpack.c.bf16 %v983_v39, %v983_v39 }
 0x34c   : > { %v1248_v43 = vsel %vm948_vm9, %v1243_v42, 0  ;;  %v1358_v32 = vsel %vm948_vm9, %v1353_v26, 0 }
 0x34d   : > { %1344 = vmatpush.bf16.xpose.msrb.mxu2 %v1007_v18  ;;  %v1041_v45 = vmul.f32 0.25, %v1038_v41  ;;  %1257 = vmatpush.bf16.xpose.msrb.mxu3 %v1248_v43  ;;  %v984_v18 = vld [vmem:[%s3176_s27 + $0x8] sm:$0xff]  ;;  %v2881_v41 = vsel %vm1061_vm11, %v987_v40, 0 }
 0x34e   : > { %v988_v20 = vpack.c.bf16 %v984_v18, %v984_v18  ;;  %1216 = vmatpush.bf16.msra.mxu0 %v2881_v41 }
 0x34f   : > { %v1042_v46 = vsel %vm2814_vm12, %v1041_v45, -1e+30 }
 0x350   : > { %v1043_v47 = vsel %vm948_vm9, %v1042_v46, -inf  ;;  %v2862_v22 = vsel %vm1061_vm11, %v988_v20, 0 }
 0x351   : > { %1044 = vmax.xlane.f32.xlu1 %v1043_v47 }
 0x352   : > { %v1039_v48 = vpop.f32.mrf.mxu1 }
 0x353   : > { %v2822_v50 = vpop.permute.xlu1 %1240  ;;  %v1351_v37 = vpop.permute.xlu0 %1350 }
 0x354   : > { %2350 = vmatmul.msk.bf16.vlgmr.msra.gmra.mxu2 %vm948_vm9, %v1223_v49 }
 0x35b   : > { %v1333_v51 = vpop.permute.xlu1 %1332 }
 0x364   : > { %2354 = vmatmul.msk.bf16.vlgmr.msrb.gmra.mxu2 %vm948_vm9, %v1333_v51 }
 0x36a   : > { %1275 = vrot.lane.b32.xlu1 %v2793_v27, %s2524_s0 }
 0x3c1   : > { %v1108_v52 = vpop.f32.mrf.mxu0 }
 0x3c4   : > { %v1045_v53 = vpop.xlane.xlu1 %1044 }
 0x3c5   : > { %v1046_v54 = vsub.f32 %v1042_v46, %v1045_v53 }
 0x3c7   : > { %v1047_v55 = vmul.f32 1.442695, %v1046_v54  ;;  %v1131_v56 = vpop.f32.mrf.mxu2 }
 0x3c8   : > { %v1132_v57 = vadd.f32 %v1131_v56, %v1108_v52 }
 0x3c9   : > { %2430 = vpow2.f32 %v1047_v55  ;;  %v1110_v58 = vpop.f32.mrf.mxu0 }
 0x3ca   : > { %v1135_v59 = vmul.f32 0.25, %v1132_v57 }
 0x3cc   : > { %v1136_v60 = vsel %vm2814_vm12, %v1135_v59, -1e+30 }
 0x3cd   : > { %v1137_v62 = vsel %vm948_vm9, %v1136_v60, -inf }
 0x3ce   : > { %1138 = vmax.xlane.f32.xlu2 %v1137_v62 }
 0x3cf   : > { %v2431_v63 = vpop.eup %2430  ;;  %v1133_v0 = vpop.f32.mrf.mxu2 }
 0x3d0   : > { %v1049_v1 = vsel %vm948_vm9, %v2431_v63, 0.0  ;;  %v1052_v28 = vpack.c.bf16 %v2431_v63, %v2431_v63 }
 0x3d1   : > { %1050 = vadd.xlane.f32.xlu1 %v1049_v1 }
 0x3d7   : > { %v2831_v3 = vpop.f32.mrf.mxu2 }
 0x3dc   : > { %v1276_v24 = vpop.permute.xlu1 %1275 }
 0x3dd   : > { %v1281_v31 = vsel %vm1061_vm11, %v1276_v24, 0 }
 0x3df   : > { %v1238_v5 = vpop.f32.mrf.mxu2 }
 0x3e6   : > { %1056 = vrot.lane.b32.xlu2 %v2793_v27, %s2519_s26 }
 0x3e7   : > { %v2836_v8 = vpop.f32.mrf.mxu2 }
 0x3ea   : > { %1560 = vrot.lane.b32.xlu1 %v2838_v9, %s2522_s3 }
 0x3ef   : > { %v1348_v10 = vpop.f32.mrf.mxu2 }
 0x3f2   : > { %1593 = vrot.lane.b32.xlu1 %v2838_v9, %s2523_s17 }
 0x3fa   : > { %1662 = vrot.lane.b32.xlu1 %v2846_v14, %s2524_s0 }
 0x402   : > { %1789 = vrot.lane.b32.xlu1 %v2838_v9, %s2525_s5 }
 0x40a   : > { %1787 = vrot.lane.b32.xlu1 %v2846_v14, %s2525_s5 }
 0x412   : > { %1503 = vrot.lane.b32.xlu1 %v2838_v9, %s2519_s26 }
 0x41a   : > { %1715 = vrot.lane.b32.xlu1 %v2838_v9, %s2524_s0 }
 0x422   : > { %1822 = vrot.lane.b32.xlu1 %v2838_v9, %s2527_s28 }
 0x441   : > { %v1139_v15 = vpop.xlane.xlu2 %1138 }
 0x442   : > { %v1140_v16 = vsub.f32 %v1136_v60, %v1139_v15 }
 0x444   : > { %v1141_v19 = vmul.f32 1.442695, %v1140_v16  ;;  %v1051_v33 = vpop.xlane.xlu1 %1050 }
 0x445   : > { %v1089_v49 = vand.u32 2147483648, %v1051_v33  ;;  %vm1083_vm14 = vweird.f32 %v1051_v33 }
 0x446   : > { %2432 = vpow2.f32 %v1141_v19 }
 0x447   : > { %2434 = vrcp.f32 %v1051_v33  ;;  %v1090_v54 = vor.u32 1.1754944e-38, %v1089_v49 }
 0x449   : > { %v1057_v21 = vpop.permute.xlu2 %1056 }
 0x44a   : > { %v1063_v23 = vsel %vm1061_vm11, %v1057_v21, 0 }
 0x44b   : > { %1072 = vmatpush.bf16.msra.mxu1 %v1063_v23 }
 0x44c   : > { %v2433_v25 = vpop.eup %2432 }
 0x44d   : > { %v1143_v29 = vsel %vm948_vm9, %v2433_v25, 0.0  ;;  %v1146_v30 = vpack.c.bf16 %v2433_v25, %v2433_v25  ;;  %v2435_v42 = vpop.eup %2434 }
 0x44e   : > { %1144 = vadd.xlane.f32.xlu0 %v1143_v29  ;;  %2344 = vmatmul.msk.bf16.vlgmr.msra.gmra.mxu1 %vm948_vm9, %v1052_v28  ;;  %v1079_v43 = vmul.f32 %v2435_v42, %v1051_v33  ;;  %vm1084_vm13 = vweird.f32 %v2435_v42 }
 0x44f   : > { %1197 = vmatpush.bf16.msrb.mxu1 %v2862_v22  ;;  %2347 = vmatmul.msk.bf16.vlgmr.msra.gmra.mxu3 %vm948_vm9, %v1146_v30  ;;  %vm1085_vm15 = vmor %vm1083_vm14, %vm1084_vm13 }
 0x450   : > { %1367 = vmatpush.bf16.xpose.msra.mxu3 %v1358_v32  ;;  %v1080_v45 = vsub.f32 1.0, %v1079_v43 }
 0x452   : > { %v1081_v46 = vmul.f32 %v2435_v42, %v1080_v45 }
 0x453   : > { %1290 = vmatpush.bf16.msra.mxu1 %v1281_v31 }
 0x454   : > { %v1082_v48 = vadd.f32 %v2435_v42, %v1081_v46 }
 0x456   : > { %v1086_v52 = vsel %vm1085_vm15, %v2435_v42, %v1082_v48 }
 0x45c   : > { %v2874_v35 = vpop.permute.xlu1 %1560 }
 0x45d   : > { %v1566_v43 = vsel %vm948_vm9, %v2874_v35, 0 }
 0x45f   : > { %2351 = vmatmul.msk.bf16.vlgmr.msrb.gmra.mxu3 %vm948_vm9, %v2822_v50  ;;  %v1087_v50 = vand.u32 2147483647, %v1051_v33 }
 0x460   : > { %1482 = vmatpush.bf16.xpose.msrb.mxu3 %v1473_v34 }
 0x461   : > { %vm1088_vm0 = vcmp.eq.f32.partialorder %v1087_v50, 8.507059e+37 }
 0x462   : > { %v1091_v57 = vsel %vm1088_vm0, %v1090_v54, %v1086_v52 }
 0x464   : > { %v1594_v36 = vpop.permute.xlu1 %1593 }
 0x465   : > { %v1599_v38 = vsel %vm1061_vm11, %v1594_v36, 0 }
 0x46c   : > { %v2904_v39 = vpop.permute.xlu1 %1662 }
 0x46f   : > { %2355 = vmatmul.msk.bf16.vlgmr.msra.gmra.mxu3 %vm948_vm9, %v1351_v37 }
 0x470   : > { %1608 = vmatpush.bf16.msra.mxu3 %v1599_v38 }
 0x47f   : > { %2359 = vmatmul.msk.bf16.vlgmr.msrb.gmra.mxu3 %vm948_vm9, %v982_v12 }
 0x4c1   : > { %v1145_v47 = vpop.xlane.xlu0 %1144 }
 0x4c2   : > { %2436 = vrcp.f32 %v1145_v47  ;;  %v1179_v59 = vand.u32 2147483648, %v1145_v47  ;;  %v1177_v62 = vand.u32 2147483647, %v1145_v47  ;;  %vm1173_vm3 = vweird.f32 %v1145_v47 }
 0x4c4   : > { %v1180_v1 = vor.u32 1.1754944e-38, %v1179_v59  ;;  %vm1178_vm5 = vcmp.eq.f32.partialorder %v1177_v62, 8.507059e+37  ;;  %v985_v59 = vld [vmem:[%s3176_s27 + $0x10] sm:$0xff] }
 0x4c8   : > { %v2437_v51 = vpop.eup %2436 }
 0x4c9   : > { %v1169_v53 = vmul.f32 %v2437_v51, %v1145_v47  ;;  %vm1174_vm2 = vweird.f32 %v2437_v51  ;;  %v2913_v47 = vpop.permute.xlu1 %1789 }
 0x4ca   : > { %vm1175_vm4 = vmor %vm1173_vm3, %vm1174_vm2 }
 0x4cb   : > { %v1170_v55 = vsub.f32 1.0, %v1169_v53  ;;  %v1074_v56 = vpop.f32.mrf.mxu1 }
 0x4cc   : > { %v1092_v58 = vmul.f32 %v1091_v57, %v1074_v56 }
 0x4cd   : > { %v1171_v60 = vmul.f32 %v2437_v51, %v1170_v55 }
 0x4ce   : > { %v1093_v63 = vpack.c.bf16 %v1092_v58, %v1092_v58 }
 0x4cf   : > { %v1172_v0 = vadd.f32 %v2437_v51, %v1171_v60  ;;  %v989_v60 = vpack.c.bf16 %v985_v59, %v985_v59 }
 0x4d0   : > { %2349 = vmatmul.msk.bf16.vlgmr.msra.gmra.mxu0 %vm948_vm9, %v1093_v63  ;;  %v986_v63 = vld [vmem:[%s3176_s27 + $0x18] sm:$0xff] }
 0x4d1   : > { %v1176_v4 = vsel %vm1175_vm4, %v2437_v51, %v1172_v0  ;;  %v2918_v51 = vpop.permute.xlu1 %1787  ;;  %v2937_v62 = vsel %vm1061_vm11, %v989_v60, 0 }
 0x4d2   : > { %v1164_v5 = vpop.f32.mrf.mxu3  ;;  %v1181_v6 = vsel %vm1178_vm5, %v1180_v1, %v1176_v4  ;;  %1325 = vmatpush.bf16.msrb.mxu0 %v2937_v62 }
 0x4d3   : > { %v1182_v7 = vmul.f32 %v1181_v6, %v1164_v5  ;;  %v1076_v10 = vpop.f32.mrf.mxu1 }
 0x4d5   : > { %v1183_v12 = vpack.c.bf16 %v1182_v7, %v1182_v7 }
 0x4d7   : > { %2348 = vmatmul.msk.bf16.vlgmr.msrb.gmra.mxu1 %vm948_vm9, %v1183_v12 }
 0x4d9   : > { %v1504_v54 = vpop.permute.xlu1 %1503 }
 0x4da   : > { %v1166_v13 = vpop.f32.mrf.mxu3  ;;  %v1509_v57 = vsel %vm1061_vm11, %v1504_v54, 0 }
 0x4e2   : > { %v1259_v15 = vpop.f32.mrf.mxu3 }
 0x4e3   : > { %v1260_v16 = vadd.f32 %v1259_v15, %v2831_v3 }
 0x4e5   : > { %v1263_v18 = vmul.f32 0.25, %v1260_v16 }
 0x4e7   : > { %v1264_v19 = vsel %vm2814_vm12, %v1263_v18, -1e+30 }
 0x4e8   : > { %v1265_v20 = vsel %vm948_vm9, %v1264_v19, -inf }
 0x4e9   : > { %1266 = vmax.xlane.f32.xlu2 %v1265_v20 }
 0x4ea   : > { %v1261_v21 = vpop.f32.mrf.mxu3 }
 0x4f2   : > { %v1369_v23 = vpop.f32.mrf.mxu3 }
 0x4f3   : > { %v1370_v24 = vadd.f32 %v1369_v23, %v2836_v8 }
 0x4f5   : > { %v1373_v25 = vmul.f32 0.25, %v1370_v24 }
 0x4f7   : > { %v1374_v26 = vsel %vm2814_vm12, %v1373_v25, -1e+30 }
 0x4f8   : > { %v1375_v28 = vsel %vm948_vm9, %v1374_v26, -inf }
 0x4f9   : > { %1376 = vmax.xlane.f32.xlu0 %v1375_v28 }
 0x4fa   : > { %v1371_v29 = vpop.f32.mrf.mxu3 }
 0x501   : > { %1448 = vrot.lane.b32.xlu2 %v2846_v14, %s2520_s2 }
 0x502   : > { %v2896_v3 = vpop.f32.mrf.mxu3 }
 0x509   : > { %1446 = vrot.lane.b32.xlu2 %v2846_v14, %s2519_s26 }
 0x50a   : > { %v1486_v30 = vpop.f32.mrf.mxu3 }
 0x50d   : > { %1385 = vrot.lane.b32.xlu0 %v2793_v27, %s2527_s28 }
 0x54d   : > { %v1218_v8 = vpop.f32.mrf.mxu0 }
 0x554   : > { %v1199_v31 = vpop.f32.mrf.mxu1 }
 0x555   : > { %v2902_v32 = vadd.f32 %v1218_v8, %v1199_v31  ;;  %v1220_v33 = vpop.f32.mrf.mxu0 }
 0x55c   : > { %v1267_v34 = vpop.xlane.xlu2 %1266  ;;  %v1201_v36 = vpop.f32.mrf.mxu1 }
 0x55d   : > { %v1268_v37 = vsub.f32 %v1264_v19, %v1267_v34 }
 0x55f   : > { %v1269_v38 = vmul.f32 1.442695, %v1268_v37 }
 0x561   : > { %2438 = vpow2.f32 %v1269_v38 }
 0x564   : > { %v1449_v40 = vpop.permute.xlu2 %1448 }
 0x565   : > { %v2907_v42 = vsel %vm948_vm9, %v1449_v40, 0 }
 0x566   : > { %1463 = vmatpush.bf16.xpose.msra.mxu2 %v2907_v42 }
 0x567   : > { %v2439_v27 = vpop.eup %2438 }
 0x568   : > { %v1274_v45 = vpack.c.bf16 %v2439_v27, %v2439_v27  ;;  %v1271_v46 = vsel %vm948_vm9, %v2439_v27, 0.0 }
 0x569   : > { %1272 = vadd.xlane.f32.xlu0 %v1271_v46 }
 0x56a   : > { %2352 = vmatmul.msk.bf16.vlgmr.msra.gmra.mxu1 %vm948_vm9, %v1274_v45 }
 0x56c   : > { %v1447_v48 = vpop.permute.xlu2 %1446  ;;  %v1377_v49 = vpop.xlane.xlu0 %1376 }
 0x56d   : > { %v1378_v50 = vsub.f32 %v1374_v26, %v1377_v49  ;;  %2358 = vmatmul.msk.bf16.vlgmr.msra.gmra.mxu2 %vm948_vm9, %v1447_v48 }
 0x56e   : > { %1575 = vmatpush.bf16.xpose.msrb.mxu2 %v1566_v43 }
 0x56f   : > { %v1379_v35 = vmul.f32 1.442695, %v1378_v50 }
 0x571   : > { %2440 = vpow2.f32 %v1379_v35 }
 0x576   : > { %1674 = vmatpush.bf16.xpose.msra.mxu2 %v2907_v42 }
 0x577   : > { %v2441_v52 = vpop.eup %2440 }
 0x578   : > { %v1381_v53 = vsel %vm948_vm9, %v2441_v52, 0.0  ;;  %v1384_v58 = vpack.c.bf16 %v2441_v52, %v2441_v52 }
 0x579   : > { %1382 = vadd.xlane.f32.xlu2 %v1381_v53 }
 0x57d   : > { %1540 = vrot.lane.b32.xlu0 %v2846_v14, %s2523_s17  ;;  %s3179_s17 = sld [smem:[#allocation19_spill]] (!%p2375_p5) }
 0x57f   : > { %v1386_v55 = vpop.permute.xlu0 %1385 }
 0x580   : > { %v1391_v56 = vsel %vm1061_vm11, %v1386_v55, 0 }
 0x581   : > { %1400 = vmatpush.bf16.msrb.mxu1 %v1391_v56 }
 0x584   : > { %2356 = vmatmul.msk.bf16.vlgmr.msrb.gmra.mxu1 %vm948_vm9, %v1384_v58 }
 0x585   : > { %1518 = vmatpush.bf16.msra.mxu1 %v1509_v57  ;;  %1682 = vrot.lane.b32.xlu0 %v2838_v9, %s2526_s4  ;;  %v990_v9 = vpack.c.bf16 %v986_v63, %v986_v63  ;;  %v1716_v57 = vpop.permute.xlu1 %1715 }
 0x586   : > { %v1721_v59 = vsel %vm1061_vm11, %v1716_v57, 0 }
 0x589   : > { %1640 = vmatpush.bf16.msrb.mxu1 %v2862_v22  ;;  %v2942_v22 = vsel %vm1061_vm11, %v990_v9, 0 }
 0x58a   : > { %1435 = vmatpush.bf16.msra.mxu0 %v2942_v22 }
 0x58d   : > { %1680 = vrot.lane.b32.xlu0 %v2846_v14, %s2526_s4 }
 0x591   : > { %1558 = vrot.lane.b32.xlu2 %v2846_v14, %s2522_s3  ;;  %s3177_s3 = scalar_lea.vmem %s3128_s10, %s2648_s23 }
 0x595   : > { %1769 = vrot.lane.b32.xlu0 %v2846_v14, %s2527_s28 }
 0x5dc   : > { %v1273_v0 = vpop.xlane.xlu0 %1272 }
 0x5dd   : > { %2442 = vrcp.f32 %v1273_v0  ;;  %v1307_v6 = vand.u32 2147483648, %v1273_v0  ;;  %v1305_v10 = vand.u32 2147483647, %v1273_v0  ;;  %vm1301_vm7 = vweird.f32 %v1273_v0 }
 0x5df   : > { %v1308_v13 = vor.u32 1.1754944e-38, %v1307_v6  ;;  %vm1306_vm13 = vcmp.eq.f32.partialorder %v1305_v10, 8.507059e+37 }
 0x5e3   : > { %v2443_v1 = vpop.eup %2442 }
 0x5e4   : > { %v1297_v4 = vmul.f32 %v2443_v1, %v1273_v0  ;;  %vm1302_vm6 = vweird.f32 %v2443_v1 }
 0x5e5   : > { %vm1303_vm8 = vmor %vm1301_vm7, %vm1302_vm6 }
 0x5e6   : > { %v1298_v5 = vsub.f32 1.0, %v1297_v4 }
 0x5e7   : > { %v1292_v14 = vpop.f32.mrf.mxu1 }
 0x5e8   : > { %v1299_v7 = vmul.f32 %v2443_v1, %v1298_v5  ;;  %v2976_v5 = vld [vmem:[%s3177_s3] ss:$0 sm:$0xff] }
 0x5ea   : > { %v1300_v12 = vadd.f32 %v2443_v1, %v1299_v7 }
 0x5ec   : > { %v1304_v15 = vsel %vm1303_vm8, %v2443_v1, %v1300_v12  ;;  %v1383_v16 = vpop.xlane.xlu2 %1382 }
 0x5ed   : > { %v1309_v18 = vsel %vm1306_vm13, %v1308_v13, %v1304_v15  ;;  %2444 = vrcp.f32 %v1383_v16  ;;  %v1417_v40 = vand.u32 2147483648, %v1383_v16  ;;  %vm1411_vm15 = vweird.f32 %v1383_v16 }
 0x5ee   : > { %v1310_v19 = vmul.f32 %v1309_v18, %v1292_v14  ;;  %v1415_v43 = vand.u32 2147483647, %v1383_v16 }
 0x5ef   : > { %v1541_v20 = vpop.permute.xlu0 %1540  ;;  %v1294_v21 = vpop.f32.mrf.mxu1  ;;  %v1418_v45 = vor.u32 1.1754944e-38, %v1417_v40 }
 0x5f0   : > { %v1311_v23 = vpack.c.bf16 %v1310_v19, %v1310_v19  ;;  %v1465_v24 = vpop.f32.mrf.mxu2  ;;  %vm1416_vm2 = vcmp.eq.f32.partialorder %v1415_v43, 8.507059e+37 }
 0x5f1   : > { %v1485_v25 = vadd.f32 %v2896_v3, %v1465_v24 }
 0x5f2   : > { %2353 = vmatmul.msk.bf16.vlgmr.msrb.gmra.mxu0 %vm948_vm9, %v1311_v23 }
 0x5f3   : > { %v2445_v26 = vpop.eup %2444  ;;  %v1488_v28 = vmul.f32 0.25, %v1485_v25  ;;  %1552 = vmatpush.bf16.xpose.msrb.mxu0 %v2907_v42 }
 0x5f4   : > { %v1407_v29 = vmul.f32 %v2445_v26, %v1383_v16  ;;  %v1559_v30 = vpop.permute.xlu2 %1558  ;;  %vm1412_vm14 = vweird.f32 %v2445_v26 }
 0x5f5   : > { %2362 = vmatmul.msk.bf16.vlgmr.msrb.gmra.mxu2 %vm948_vm9, %v1559_v30  ;;  %v1489_v8 = vsel %vm2814_vm12, %v1488_v28, -1e+30  ;;  %vm1413_vm0 = vmor %vm1411_vm15, %vm1412_vm14 }
 0x5f6   : > { %v1408_v31 = vsub.f32 1.0, %v1407_v29  ;;  %1781 = vmatpush.bf16.xpose.msrb.mxu2 %v2907_v42  ;;  %v1490_v33 = vsel %vm948_vm9, %v1489_v8, -inf }
 0x5f7   : > { %v1683_v34 = vpop.permute.xlu0 %1682  ;;  %1491 = vmax.xlane.f32.xlu0 %v1490_v33  ;;  %v1795_v33 = vsel %vm948_vm9, %v2913_v47, 0 }
 0x5f8   : > { %v1688_v3 = vsel %vm948_vm9, %v1683_v34, 0  ;;  %v1467_v36 = vpop.f32.mrf.mxu2  ;;  %v1409_v37 = vmul.f32 %v2445_v26, %v1408_v31 }
 0x5f9   : > { %1697 = vmatpush.bf16.xpose.msrb.mxu3 %v1688_v3 }
 0x5fa   : > { %v1410_v38 = vadd.f32 %v2445_v26, %v1409_v37 }
 0x5fc   : > { %v1414_v27 = vsel %vm1413_vm0, %v2445_v26, %v1410_v38 }
 0x5fd   : > { %v1419_v42 = vsel %vm1416_vm2, %v1418_v45, %v1414_v27 }
 0x5ff   : > { %v1681_v35 = vpop.permute.xlu0 %1680 }
 0x601   : > { %v1402_v46 = vpop.f32.mrf.mxu1 }
 0x602   : > { %v1420_v48 = vmul.f32 %v1419_v42, %v1402_v46 }
 0x604   : > { %v1421_v49 = vpack.c.bf16 %v1420_v48, %v1420_v48 }
 0x605   : > { %2366 = vmatmul.msk.bf16.vlgmr.msra.gmra.mxu2 %vm948_vm9, %v2904_v39 }
 0x606   : > { %2357 = vmatmul.msk.bf16.vlgmr.msra.gmra.mxu0 %vm948_vm9, %v1421_v49 }
 0x607   : > { %1656 = vmatpush.bf16.msra.mxu0 %v2881_v41  ;;  %v1770_v52 = vpop.permute.xlu0 %1769 }
 0x609   : > { %v1404_v50 = vpop.f32.mrf.mxu1 }
 0x60a   : > { %v1823_v50 = vpop.permute.xlu1 %1822 }
 0x615   : > { %2370 = vmatmul.msk.bf16.vlgmr.msrb.gmra.mxu2 %vm948_vm9, %v1770_v52 }
 0x616   : > { %2361 = vmatmul.msk.bf16.vlgmr.msrb.gmra.mxu0 %vm948_vm9, %v1541_v20 }
 0x617   : > { %1762 = vmatpush.bf16.msrb.mxu0 %v2937_v62 }
 0x66a   : > { %v1492_v53 = vpop.xlane.xlu0 %1491 }
 0x66b   : > { %v1493_v54 = vsub.f32 %v1489_v8, %v1492_v53 }
 0x66d   : > { %v1494_v55 = vmul.f32 1.442695, %v1493_v54 }
 0x66f   : > { %2446 = vpow2.f32 %v1494_v55  ;;  %v1327_v56 = vpop.f32.mrf.mxu0 }
 0x670   : > { %v1331_v63 = vadd.f32 %v1327_v56, %v2902_v32 }
 0x675   : > { %v2961_v39 = vpop.eup %2446 }
 0x676   : > { %v1499_v41 = vpack.c.bf16 %v2961_v39, %v2961_v39 }
 0x677   : > { %v1329_v58 = vpop.f32.mrf.mxu0 }
 0x678   : > { %2360 = vmatmul.msk.bf16.vlgmr.msra.gmra.mxu1 %vm948_vm9, %v1499_v41  ;;  %v1577_v60 = vpop.f32.mrf.mxu2 }
 0x679   : > { %1730 = vmatpush.bf16.msra.mxu1 %v1721_v59 }
 0x680   : > { %v1579_v62 = vpop.f32.mrf.mxu2 }
 0x683   : > { %v1437_v9 = vpop.f32.mrf.mxu0 }
 0x684   : > { %v1441_v0 = vadd.f32 %v1437_v9, %v1331_v63 }
 0x686   : > { %1442 = vst.msk [vmem:[#allocation3] sm:$0xff] %vm834_vm1, %v1441_v0  ;;  %v1496_v0 = vsel %vm948_vm9, %v2961_v39, 0.0 }
 0x688   : > { %v2969_v1 = vpop.f32.mrf.mxu2 }
 0x68b   : > { %v1439_v4 = vpop.f32.mrf.mxu0 }
 0x68d   : > { %v1877_v14 = vld [vmem:[#allocation3] sm:$0xff] }
 0x68e   : > { %v1879_v6 = vadd.f32 %v1877_v14, %v2723_v2 }
 0x690   : > { %v1678_v7 = vpop.f32.mrf.mxu2  ;;  %v2980_v10 = vadd.f32 %v2976_v5, %v1879_v6 }
 0x692   : > { %v1888_v32 = vmul.f32 %v2980_v10, %v2980_v10 }
 0x693   : > { %v1554_v12 = vpop.f32.mrf.mxu0 }
 0x694   : > { %v1578_v13 = vadd.f32 %v1577_v60, %v1554_v12  ;;  %v1890_v15 = vsel %vm834_vm1, %v1888_v32, 0.0 }
 0x695   : > { %1891 = vadd.xlane.f32.xlu0 %v1890_v15 }
 0x696   : > { %v1581_v16 = vmul.f32 0.25, %v1578_v13 }
 0x698   : > { %v1783_v18 = vpop.f32.mrf.mxu2  ;;  %v1582_v19 = vsel %vm2814_vm12, %v1581_v16, -1e+30 }
 0x699   : > { %v1583_v20 = vsel %vm948_vm9, %v1582_v19, -inf }
 0x69a   : > { %1584 = vmax.xlane.f32.xlu2 %v1583_v20 }
 0x69b   : > { %v1556_v2 = vpop.f32.mrf.mxu0 }
 0x6a0   : > { %v1785_v21 = vpop.f32.mrf.mxu2 }
 0x6a9   : > { %933 = vrot.lane.b32.xlu0 %v2758_v61, %s2521_s20 }
 0x6b1   : > { %942 = vrot.lane.b32.xlu0 %v2758_v61, %s2520_s2 }
 0x6f5   : > { %v2992_v23 = vpop.f32.mrf.mxu1 }
 0x6fd   : > { %v1522_v24 = vpop.f32.mrf.mxu1 }
 0x708   : > { %v2994_v29 = vpop.xlane.xlu0 %1891 }
 0x70d   : > { %v1585_v25 = vpop.xlane.xlu2 %1584 }
 0x70e   : > { %v1586_v26 = vsub.f32 %v1582_v19, %v1585_v25 }
 0x710   : > { %v1587_v28 = vmul.f32 1.442695, %v1586_v26 }
 0x712   : > { %2448 = vpow2.f32 %v1587_v28 }
 0x718   : > { %v2449_v30 = vpop.eup %2448 }
 0x719   : > { %v1592_v8 = vpack.c.bf16 %v2449_v30, %v2449_v30  ;;  %v1589_v31 = vsel %vm948_vm9, %v2449_v30, 0.0 }
 0x71a   : > { %1590 = vadd.xlane.f32.xlu2 %v1589_v31 }
 0x71b   : > { %v934_v34 = vpop.permute.xlu0 %933  ;;  %2363 = vmatmul.msk.bf16.vlgmr.msra.gmra.mxu3 %vm948_vm9, %v1592_v8 }
 0x71c   : > { %940 = vst.msk [vmem:[%s2709_s24] sm:$0xff] %vm939_vm10, %v934_v34  ;;  %1804 = vmatpush.bf16.xpose.msra.mxu3 %v1795_v33 }
 0x723   : > { %v943_v61 = vpop.permute.xlu0 %942 }
 0x724   : > { %949 = vst.msk [vmem:[%s2714_s16] sm:$0xff] %vm948_vm9, %v943_v61 }
 0x72b   : > { %2367 = vmatmul.msk.bf16.vlgmr.msrb.gmra.mxu3 %vm948_vm9, %v1681_v35  ;;  %v1828_v35 = vsel %vm1061_vm11, %v1823_v50, 0 }
 0x73b   : > { %2371 = vmatmul.msk.bf16.vlgmr.msra.gmra.mxu3 %vm948_vm9, %v2918_v51 }
 0x78d   : > { %v1591_v3 = vpop.xlane.xlu2 %1590 }
 0x78e   : > { %2450 = vrcp.f32 %v1591_v3  ;;  %v1625_v47 = vand.u32 2147483648, %v1591_v3  ;;  %v1623_v43 = vand.u32 2147483647, %v1591_v3  ;;  %vm1619_vm4 = vweird.f32 %v1591_v3 }
 0x790   : > { %v1626_v45 = vor.u32 1.1754944e-38, %v1625_v47  ;;  %vm1624_vm6 = vcmp.eq.f32.partialorder %v1623_v43, 8.507059e+37 }
 0x794   : > { %v2451_v36 = vpop.eup %2450 }
 0x795   : > { %v1615_v37 = vmul.f32 %v2451_v36, %v1591_v3  ;;  %vm1620_vm3 = vweird.f32 %v2451_v36 }
 0x796   : > { %vm1621_vm5 = vmor %vm1619_vm4, %vm1620_vm3 }
 0x797   : > { %v1616_v38 = vsub.f32 1.0, %v1615_v37 }
 0x799   : > { %v1617_v40 = vmul.f32 %v2451_v36, %v1616_v38 }
 0x79b   : > { %v1618_v27 = vadd.f32 %v2451_v36, %v1617_v40 }
 0x79d   : > { %v1622_v46 = vsel %vm1621_vm5, %v2451_v36, %v1618_v27 }
 0x79e   : > { %v1610_v42 = vpop.f32.mrf.mxu3  ;;  %v1627_v48 = vsel %vm1624_vm6, %v1626_v45, %v1622_v46 }
 0x79f   : > { %v1628_v49 = vmul.f32 %v1627_v48, %v1610_v42 }
 0x7a1   : > { %v1629_v51 = vpack.c.bf16 %v1628_v49, %v1628_v49 }
 0x7a3   : > { %2364 = vmatmul.msk.bf16.vlgmr.msrb.gmra.mxu1 %vm948_vm9, %v1629_v51 }
 0x7a4   : > { %1837 = vmatpush.bf16.msrb.mxu1 %v1828_v35 }
 0x7a6   : > { %v1612_v52 = vpop.f32.mrf.mxu3 }
 0x7ae   : > { %v1699_v53 = vpop.f32.mrf.mxu3 }
 0x7af   : > { %v1700_v54 = vadd.f32 %v1699_v53, %v2969_v1 }
 0x7b1   : > { %v1703_v55 = vmul.f32 0.25, %v1700_v54 }
 0x7b3   : > { %v1704_v56 = vsel %vm2814_vm12, %v1703_v55, -1e+30 }
 0x7b4   : > { %v1705_v57 = vsel %vm948_vm9, %v1704_v56, -inf }
 0x7b5   : > { %1706 = vmax.xlane.f32.xlu2 %v1705_v57 }
 0x7b6   : > { %v1701_v41 = vpop.f32.mrf.mxu3 }
 0x7be   : > { %v1806_v58 = vpop.f32.mrf.mxu3 }
 0x7bf   : > { %v1807_v59 = vadd.f32 %v1806_v58, %v1783_v18 }
 0x7c1   : > { %v1810_v60 = vmul.f32 0.25, %v1807_v59 }
 0x7c3   : > { %v1811_v62 = vsel %vm2814_vm12, %v1810_v60, -1e+30 }
 0x7c4   : > { %v1812_v63 = vsel %vm948_vm9, %v1811_v62, -inf }
 0x7c5   : > { %1813 = vmax.xlane.f32.xlu2 %v1812_v63 }
 0x7c6   : > { %v1808_v9 = vpop.f32.mrf.mxu3 }
 0x7cd   : > { %1497 = vadd.xlane.f32.xlu2 %v1496_v0 }
 0x820   : > { %v3018_v1 = vpop.f32.mrf.mxu1 }
 0x828   : > { %v1707_v4 = vpop.xlane.xlu2 %1706  ;;  %v1644_v14 = vpop.f32.mrf.mxu1 }
 0x829   : > { %v1708_v6 = vsub.f32 %v1704_v56, %v1707_v4 }
 0x82b   : > { %v1709_v7 = vmul.f32 1.442695, %v1708_v6 }
 0x82d   : > { %2452 = vpow2.f32 %v1709_v7 }
 0x833   : > { %v2453_v32 = vpop.eup %2452 }
 0x834   : > { %v1714_v12 = vpack.c.bf16 %v2453_v32, %v2453_v32  ;;  %v1711_v44 = vsel %vm948_vm9, %v2453_v32, 0.0 }
 0x835   : > { %1712 = vadd.xlane.f32.xlu1 %v1711_v44 }
 0x836   : > { %2368 = vmatmul.msk.bf16.vlgmr.msra.gmra.mxu1 %vm948_vm9, %v1714_v12 }
 0x838   : > { %v1814_v13 = vpop.xlane.xlu2 %1813 }
 0x839   : > { %v1815_v15 = vsub.f32 %v1811_v62, %v1814_v13 }
 0x83b   : > { %v1816_v16 = vmul.f32 1.442695, %v1815_v15 }
 0x83d   : > { %2454 = vpow2.f32 %v1816_v16  ;;  %v2470_v16 = vld [vmem:[#allocation2 + $0x8] sm:$0xff] }
 0x840   : > { %v1498_v39 = vpop.xlane.xlu2 %1497 }
 0x841   : > { %2456 = vrcp.f32 %v1498_v39  ;;  %v1535_v25 = vand.u32 2147483648, %v1498_v39  ;;  %v1533_v28 = vand.u32 2147483647, %v1498_v39  ;;  %vm1529_vm12 = vweird.f32 %v1498_v39 }
 0x843   : > { %v2455_v18 = vpop.eup %2454  ;;  %v1536_v8 = vor.u32 1.1754944e-38, %v1535_v25  ;;  %vm1534_vm8 = vcmp.eq.f32.partialorder %v1533_v28, 8.507059e+37 }
 0x844   : > { %v1821_v19 = vpack.c.bf16 %v2455_v18, %v2455_v18  ;;  %v1818_v20 = vsel %vm948_vm9, %v2455_v18, 0.0 }
 0x845   : > { %1819 = vadd.xlane.f32.xlu2 %v1818_v20  ;;  %v1896_v20 = vmul.f32 %v2994_v29, %v2731_v17 }
 0x846   : > { %2372 = vmatmul.msk.bf16.vlgmr.msrb.gmra.mxu1 %vm948_vm9, %v1821_v19 }
 0x847   : > { %v2457_v2 = vpop.eup %2456 }
 0x848   : > { %v1525_v21 = vmul.f32 %v2457_v2, %v1498_v39  ;;  %vm1530_vm11 = vweird.f32 %v2457_v2 }
 0x849   : > { %vm1531_vm7 = vmor %vm1529_vm12, %vm1530_vm11 }
 0x84a   : > { %v1526_v24 = vsub.f32 1.0, %v1525_v21  ;;  %v1929_v21 = vld [vmem:[%s2690_s1 + $0x10] sm:$0xff] }
 0x84c   : > { %v1527_v26 = vmul.f32 %v2457_v2, %v1526_v24  ;;  %v1930_v24 = vld [vmem:[%s2690_s1 + $0x18] sm:$0xff] }
 0x84d   : > { %v1933_v25 = vpack.c.bf16 %v1930_v24, %v1929_v21 }
 0x84e   : > { %v1528_v30 = vadd.f32 %v2457_v2, %v1527_v26  ;;  %944 = vrot.lane.b32.xlu1 %v2771_v11, %s2520_s2  ;;  %v1928_v26 = vld [vmem:[%s2690_s1 + $0x8] sm:$0xff]  ;;  %s3178_s2 = scalar_lea.vmem %s3133_s15, %s2648_s23 }
 0x84f   : > { %1947 = vmatpush.bf16.msra.mxu2 %v1933_v25 }
 0x850   : > { %v1532_v31 = vsel %vm1531_vm7, %v2457_v2, %v1528_v30  ;;  %v1898_v2 = vadd.f32 1.1920929e-07, %v1896_v20 }
 0x851   : > { %v1537_v33 = vsel %vm1534_vm8, %v1536_v8, %v1532_v31 }
 0x852   : > { %v1538_v34 = vmul.f32 %v1537_v33, %v2992_v23  ;;  %vm1906_vm6 = vweird.f32 %v1898_v2 }
 0x854   : > { %v1539_v61 = vpack.c.bf16 %v1538_v34, %v1538_v34 }
 0x856   : > { %2365 = vmatmul.msk.bf16.vlgmr.msra.gmra.mxu0 %vm948_vm9, %v1539_v61 }
 0x857   : > { %1869 = vmatpush.bf16.msra.mxu0 %v2942_v22 }
 0x8a8   : > { %v1713_v3 = vpop.xlane.xlu1 %1712 }
 0x8a9   : > { %2458 = vrcp.f32 %v1713_v3  ;;  %v1747_v40 = vand.u32 2147483648, %v1713_v3  ;;  %v1745_v27 = vand.u32 2147483647, %v1713_v3  ;;  %vm1741_vm14 = vweird.f32 %v1713_v3 }
 0x8ab   : > { %v1748_v23 = vor.u32 1.1754944e-38, %v1747_v40  ;;  %vm1746_vm0 = vcmp.eq.f32.partialorder %v1745_v27, 8.507059e+37 }
 0x8af   : > { %v2459_v36 = vpop.eup %2458 }
 0x8b0   : > { %v1737_v37 = vmul.f32 %v2459_v36, %v1713_v3  ;;  %vm1742_vm13 = vweird.f32 %v2459_v36 }
 0x8b1   : > { %vm1743_vm15 = vmor %vm1741_vm14, %vm1742_vm13 }
 0x8b2   : > { %v1738_v38 = vsub.f32 1.0, %v1737_v37 }
 0x8b3   : > { %v1732_v47 = vpop.f32.mrf.mxu1 }
 0x8b4   : > { %v1739_v43 = vmul.f32 %v2459_v36, %v1738_v38 }
 0x8b6   : > { %v1740_v45 = vadd.f32 %v2459_v36, %v1739_v43 }
 0x8b8   : > { %v1744_v46 = vsel %vm1743_vm15, %v2459_v36, %v1740_v45  ;;  %v1820_v42 = vpop.xlane.xlu2 %1819 }
 0x8b9   : > { %v1749_v48 = vsel %vm1746_vm0, %v1748_v23, %v1744_v46  ;;  %2460 = vrcp.f32 %v1820_v42  ;;  %v1854_v55 = vand.u32 2147483648, %v1820_v42  ;;  %v1852_v57 = vand.u32 2147483647, %v1820_v42  ;;  %v2421_v23 = vld [vmem:[%s792_s6] ss:$0 sm:$0xff] }
 0x8ba   : > { %v1750_v22 = vmul.f32 %v1749_v48, %v1732_v47  ;;  %vm1848_vm3 = vweird.f32 %v1820_v42  ;;  %2462 = vrsqrt.f32 %v1898_v2 }
 0x8bb   : > { %v1734_v49 = vpop.f32.mrf.mxu1  ;;  %v1855_v58 = vor.u32 1.1754944e-38, %v1854_v55  ;;  %vm1853_vm5 = vcmp.eq.f32.partialorder %v1852_v57, 8.507059e+37  ;;  %v1984_v57 = vld [vmem:[%s2704_s29 + $0x58] sm:$0xff] }
 0x8bc   : > { %v1751_v50 = vpack.c.bf16 %v1750_v22, %v1750_v22 }
 0x8be   : > { %2369 = vmatmul.msk.bf16.vlgmr.msrb.gmra.mxu0 %vm948_vm9, %v1751_v50 }
 0x8bf   : > { %v2461_v51 = vpop.eup %2460 }
 0x8c0   : > { %v1844_v35 = vmul.f32 %v2461_v51, %v1820_v42  ;;  %v945_v52 = vpop.permute.xlu1 %944  ;;  %vm1849_vm2 = vweird.f32 %v2461_v51  ;;  %v2463_v30 = vpop.eup %2462 }
 0x8c1   : > { %950 = vst.msk [vmem:[%s2714_s16 + $0x8] sm:$0xff] %vm948_vm9, %v945_v52  ;;  %vm1850_vm4 = vmor %vm1848_vm3, %vm1849_vm2  ;;  %v1901_v8 = vmul.f32 %v2463_v30, %v1898_v2 }
 0x8c2   : > { %v1845_v53 = vsub.f32 1.0, %v1844_v35  ;;  %v1988_v35 = vld [vmem:[%s2704_s29 + $0x78] sm:$0xff] }
 0x8c3   : > { %v1839_v54 = vpop.f32.mrf.mxu1 }
 0x8c4   : > { %v1846_v56 = vmul.f32 %v2461_v51, %v1845_v53  ;;  %v1985_v53 = vld [vmem:[%s2704_s29 + $0x60] sm:$0xff] }
 0x8c6   : > { %v1847_v41 = vadd.f32 %v2461_v51, %v1846_v56  ;;  %v1983_v56 = vld [vmem:[%s2704_s29 + $0x50] sm:$0xff] }
 0x8c8   : > { %v1851_v59 = vsel %vm1850_vm4, %v2461_v51, %v1847_v41  ;;  %v1987_v51 = vld [vmem:[%s2704_s29 + $0x70] sm:$0xff]  ;;  %v1995_v41 = vpack.c.bf16 %v1984_v57, %v1983_v56 }
 0x8c9   : > { %v1856_v60 = vsel %vm1853_vm5, %v1855_v58, %v1851_v59  ;;  %v1997_v52 = vpack.c.bf16 %v1988_v35, %v1987_v51  ;;  %v1981_v58 = vld [vmem:[%s2704_s29 + $0x40] sm:$0xff]  ;;  %v1982_v59 = vld [vmem:[%s2704_s29 + $0x48] sm:$0xff] }
 0x8ca   : > { %v1857_v62 = vmul.f32 %v1856_v60, %v1839_v54  ;;  %v1986_v54 = vld [vmem:[%s2704_s29 + $0x68] sm:$0xff]  ;;  %v1994_v60 = vpack.c.bf16 %v1982_v59, %v1981_v58 }
 0x8cb   : > { %v1841_v63 = vpop.f32.mrf.mxu1  ;;  %1998 = vmatpush.bf16.msrb.mxu3 %v1997_v52  ;;  %v1996_v55 = vpack.c.bf16 %v1986_v54, %v1985_v53 }
 0x8cc   : > { %v1858_v9 = vpack.c.bf16 %v1857_v62, %v1857_v62  ;;  %v1979_v62 = vld [vmem:[%s2704_s29 + $0x30] sm:$0xff]  ;;  %v1980_v63 = vld [vmem:[%s2704_s29 + $0x38] sm:$0xff] }
 0x8ce   : > { %2373 = vmatmul.msk.bf16.vlgmr.msra.gmra.mxu0 %vm948_vm9, %v1858_v9  ;;  %vm1907_vm9 = vweird.f32 %v2463_v30  ;;  %v1993_v9 = vpack.c.bf16 %v1980_v63, %v1979_v62 }
 0x8cf   : > { %vm1908_vm11 = vmor %vm1906_vm6, %vm1907_vm9  ;;  %1999 = vmatpush.bf16.msrb.mxu3 %v1996_v55 }
 0x8d3   : > { %v1658_v0 = vpop.f32.mrf.mxu0  ;;  %2000 = vmatpush.bf16.msrb.mxu3 %v1995_v41 }
 0x8d4   : > { %v1659_v7 = vadd.f32 %v1658_v0, %v3018_v1  ;;  %v1977_v0 = vld [vmem:[%s2704_s29 + $0x20] sm:$0xff] }
 0x8d7   : > { %2001 = vmatpush.bf16.msrb.mxu3 %v1994_v60 }
 0x8db   : > { %v1660_v4 = vpop.f32.mrf.mxu0  ;;  %2002 = vmatpush.bf16.msrb.mxu3 %v1993_v9 }
 0x8dc   : > { %v1978_v4 = vld [vmem:[%s2704_s29 + $0x28] sm:$0xff] }
 0x93b   : > { %v1764_v14 = vpop.f32.mrf.mxu0 }
 0x93c   : > { %v1768_v32 = vadd.f32 %v1764_v14, %v1659_v7  ;;  %v1992_v14 = vpack.c.bf16 %v1978_v4, %v1977_v0  ;;  %v1976_v7 = vld [vmem:[%s2704_s29 + $0x18] sm:$0xff] }
 0x93e   : > { %2003 = vmatpush.bf16.msrb.mxu3 %v1992_v14 }
 0x943   : > { %v1766_v6 = vpop.f32.mrf.mxu0 }
 0x944   : > { %v1975_v6 = vld [vmem:[%s2704_s29 + $0x10] sm:$0xff] }
 0x94b   : > { %v1871_v12 = vpop.f32.mrf.mxu0 }
 0x94c   : > { %v1875_v44 = vadd.f32 %v1871_v12, %v1768_v32  ;;  %v1991_v32 = vpack.c.bf16 %v1976_v7, %v1975_v6  ;;  %v2422_v12 = vld [vmem:[%s800_s7] ss:$0 sm:$0xff] }
 0x94e   : > { %1876 = vst.msk [vmem:[#allocation3 + $0x8] sm:$0xff] %vm834_vm1, %v1875_v44  ;;  %2004 = vmatpush.bf16.msrb.mxu3 %v1991_v32  ;;  %v1973_v44 = vld [vmem:[%s2704_s29] sm:$0xff] }
 0x953   : > { %v1873_v13 = vpop.f32.mrf.mxu0 }
 0x954   : > { %v1974_v13 = vld [vmem:[%s2704_s29 + $0x8] sm:$0xff] }
 0x955   : > { %v1878_v15 = vld [vmem:[#allocation3 + $0x8] sm:$0xff] }
 0x956   : > { %v1880_v39 = vadd.f32 %v2470_v16, %v1878_v15  ;;  %v1990_v16 = vpack.c.bf16 %v1974_v13, %v1973_v44 }
 0x958   : > { %v3036_v18 = vadd.f32 %v2976_v5, %v1880_v39  ;;  %v1927_v5 = vld [vmem:[%s2690_s1] sm:$0xff]  ;;  %2005 = vmatpush.bf16.msrb.mxu3 %v1990_v16 }
 0x959   : > { %v1932_v28 = vpack.c.bf16 %v1928_v26, %v1927_v5 }
 0x95a   : > { %v1889_v19 = vmul.f32 %v3036_v18, %v3036_v18 }
 0x95b   : > { %1948 = vmatpush.bf16.msra.mxu2 %v1932_v28 }
 0x95c   : > { %v1893_v1 = vsel %vm834_vm1, %v1889_v19, 0.0 }
 0x95d   : > { %1894 = vadd.xlane.f32.xlu2 %v1893_v1 }
 0x975   : > { %935 = vrot.lane.b32.xlu2 %v2771_v11, %s2521_s20  ;;  %v1902_v11 = vmul.f32 %v2463_v30, %v1901_v8 }
 0x977   : > { %v1903_v29 = vmul.f32 0.5, %v1902_v11 }
 0x979   : > { %v1904_v3 = vsub.f32 1.5, %v1903_v29 }
 0x97b   : > { %v1905_v38 = vmul.f32 %v2463_v30, %v1904_v3 }
 0x97d   : > { %v1909_v43 = vsel %vm1908_vm11, %v2463_v30, %v1905_v38  ;;  %v2423_v38 = vld [vmem:[%s3178_s2] ss:$0 sm:$0xff] }
 0x97e   : > { %v1920_v46 = vmul.f32 %v1909_v43, %v2980_v10 }
 0x980   : > { %v1925_v22 = vmul.f32 %v2421_v23, %v1920_v46 }
 0x9d0   : > { %v1895_v31 = vpop.xlane.xlu2 %1894 }
 0x9d1   : > { %v1897_v33 = vmul.f32 %v1895_v31, %v2731_v17 }
 0x9d3   : > { %v1899_v34 = vadd.f32 1.1920929e-07, %v1897_v33 }
 0x9d5   : > { %2464 = vrsqrt.f32 %v1899_v34  ;;  %vm1916_vm7 = vweird.f32 %v1899_v34 }
 0x9d8   : > { %v936_v61 = vpop.permute.xlu2 %935 }
 0x9d9   : > { %941 = vst.msk [vmem:[%s2709_s24 + $0x8] sm:$0xff] %vm939_vm10, %v936_v61  ;;  %s3180_s24 = sld [smem:[#allocation18_spill]] (!%p2375_p5) }
 0x9db   : > { %v2465_v36 = vpop.eup %2464 }
 0x9dc   : > { %v1911_v37 = vmul.f32 %v2465_v36, %v1899_v34  ;;  %vm1917_vm12 = vweird.f32 %v2465_v36 }
 0x9dd   : > { %vm1918_vm10 = vmor %vm1916_vm7, %vm1917_vm12 }
 0x9de   : > { %v1912_v47 = vmul.f32 %v2465_v36, %v1911_v37 }
 0x9e0   : > { %v1913_v40 = vmul.f32 0.5, %v1912_v47 }
 0x9e2   : > { %v1914_v27 = vsub.f32 1.5, %v1913_v40 }
 0x9e4   : > { %v1915_v45 = vmul.f32 %v2465_v36, %v1914_v27 }
 0x9e6   : > { %v1919_v42 = vsel %vm1918_vm10, %v2465_v36, %v1915_v45 }
 0x9e7   : > { %v1921_v48 = vmul.f32 %v1919_v42, %v3036_v18 }
 0x9e9   : > { %v1926_v49 = vmul.f32 %v2421_v23, %v1921_v48 }
 0x9eb   : > { %v1931_v50 = vpack.c.bf16 %v1926_v49, %v1925_v22 }
 0x9ed   : > { %2374 = vmatmul.msk.bf16.vlgmr.msra.gmra.mxu2 %vm834_vm1, %v1931_v50 }
 0xa70   : > { %v1950_v15 = vpop.f32.mrf.mxu2 }
 0xa71   : > { %v1951_v39 = vadd.f32 %v2422_v12, %v1950_v15 }
 0xa73   : > { %v1955_v19 = vmul.f32 %v1951_v39, %v1951_v39 }
 0xa75   : > { %v1957_v1 = vmul.f32 %v1955_v19, %v1951_v39 }
 0xa77   : > { %v1959_v20 = vmul.f32 0.044715, %v1957_v1 }
 0xa78   : > { %v1952_v2 = vpop.f32.mrf.mxu2 }
 0xa79   : > { %v1961_v21 = vadd.f32 %v1959_v20, %v1951_v39  ;;  %v1953_v24 = vadd.f32 %v2422_v12, %v1952_v2 }
 0xa7b   : > { %v1963_v25 = vmul.f32 0.7978846, %v1961_v21  ;;  %v1956_v5 = vmul.f32 %v1953_v24, %v1953_v24 }
 0xa7d   : > { %v1958_v26 = vmul.f32 %v1956_v5, %v1953_v24  ;;  %2466 = vtanh.f32 %v1963_v25 }
 0xa7f   : > { %v1960_v28 = vmul.f32 0.044715, %v1958_v26 }
 0xa81   : > { %v1962_v30 = vadd.f32 %v1960_v28, %v1953_v24 }
 0xa83   : > { %v1964_v8 = vmul.f32 0.7978846, %v1962_v30  ;;  %v2467_v31 = vpop.eup %2466 }
 0xa84   : > { %v1967_v33 = vadd.f32 1.0, %v2467_v31 }
 0xa85   : > { %2468 = vtanh.f32 %v1964_v8 }
 0xa86   : > { %v1969_v34 = vmul.f32 0.5, %v1967_v33 }
 0xa88   : > { %v1971_v3 = vmul.f32 %v1969_v34, %v1951_v39 }
 0xa8b   : > { %v2469_v11 = vpop.eup %2468 }
 0xa8c   : > { %v1968_v29 = vadd.f32 1.0, %v2469_v11 }
 0xa8e   : > { %v1970_v61 = vmul.f32 0.5, %v1968_v29 }
 0xa90   : > { %v1972_v36 = vmul.f32 %v1970_v61, %v1953_v24 }
 0xa92   : > { %v1989_v37 = vpack.c.bf16 %v1972_v36, %v1971_v3 }
 0xa94   : > { %2006 = vmatmul.bf16.vlgmr.msrb.gmra.mxu3 %v1989_v37 }
 0xb17   : > { %v2007_v47 = vpop.f32.mrf.mxu3 }
 0xb18   : > { %v2012_v40 = vadd.f32 %v2007_v47, %v2980_v10 }
 0xb1a   : > { %v2018_v43 = vadd.f32 %v2423_v38, %v2012_v40 }
 0xb1c   : > { %2020 = vst.msk [vmem:[#allocation2] sm:$0xff] %vm834_vm1, %v2018_v43 }
 0xb1f   : > { %v2009_v27 = vpop.f32.mrf.mxu3 }
 0xb20   : > { %v2013_v45 = vadd.f32 %v2009_v27, %v3036_v18  ;;  %2025 = sbr.rel (%p2375_p5) target bundleno = 3143 (0xc47), region = 100 }
 0xb22   : > { %v2019_v23 = vadd.f32 %v2423_v38, %v2013_v45 }
 0xb24   : > { %2021 = vst.msk [vmem:[#allocation2 + $0x8] sm:$0xff] %vm834_vm1, %v2019_v23 }
 0xb25   : > { %v2027_v46 = vmul.f32 %v2018_v43, %v2018_v43  ;;  %v2028_v48 = vmul.f32 %v2019_v23, %v2019_v23  ;;  %v2068_v10 = vld [vmem:[%s3179_s17 + $0x10] sm:$0xff]  ;;  %v2069_v18 = vld [vmem:[%s3179_s17 + $0x18] sm:$0xff]  ;;  %v2066_v50 = vld [vmem:[%s3179_s17] sm:$0xff]  ;;  %vm2090_vm3 = vcmask 523264  }
 0xb26   : > { %v2072_v49 = vpack.c.bf16 %v2069_v18, %v2068_v10  ;;  %v2067_v51 = vld [vmem:[%s3179_s17 + $0x8] sm:$0xff]  ;;  %v2471_v12 = vld [vmem:[%s3180_s24] ss:$0 sm:$0xff] }
 0xb27   : > { %v2029_v42 = vsel %vm834_vm1, %v2027_v46, 0.0  ;;  %v2032_v22 = vsel %vm834_vm1, %v2028_v48, 0.0  ;;  %v2071_v35 = vpack.c.bf16 %v2067_v51, %v2066_v50 }
 0xb28   : > { %2030 = vadd.xlane.f32.xlu0 %v2029_v42  ;;  %2082 = vmatpush.bf16.msra.mxu0 %v2072_v49 }
 0xb2c   : > { %2083 = vmatpush.bf16.msra.mxu0 %v2071_v35 }
 0xb30   : > { %2033 = vadd.xlane.f32.xlu0 %v2032_v22 }
 0xb9b   : > { %v2031_v52 = vpop.xlane.xlu0 %2030 }
 0xb9c   : > { %v2035_v53 = vmul.f32 %v2031_v52, %v2731_v17 }
 0xb9e   : > { %v2037_v54 = vadd.f32 1.1920929e-07, %v2035_v53 }
 0xba0   : > { %2472 = vrsqrt.f32 %v2037_v54  ;;  %vm2045_vm13 = vweird.f32 %v2037_v54 }
 0xba3   : > { %v2034_v55 = vpop.xlane.xlu0 %2033 }
 0xba4   : > { %v2036_v56 = vmul.f32 %v2034_v55, %v2731_v17 }
 0xba6   : > { %v2473_v57 = vpop.eup %2472  ;;  %v2038_v41 = vadd.f32 1.1920929e-07, %v2036_v56 }
 0xba7   : > { %v2040_v58 = vmul.f32 %v2473_v57, %v2037_v54  ;;  %vm2046_vm8 = vweird.f32 %v2473_v57 }
 0xba8   : > { %2474 = vrsqrt.f32 %v2038_v41  ;;  %vm2047_vm14 = vmor %vm2045_vm13, %vm2046_vm8  ;;  %vm2055_vm0 = vweird.f32 %v2038_v41 }
 0xba9   : > { %v2041_v59 = vmul.f32 %v2473_v57, %v2040_v58 }
 0xbab   : > { %v2042_v60 = vmul.f32 0.5, %v2041_v59 }
 0xbad   : > { %v2043_v62 = vsub.f32 1.5, %v2042_v60 }
 0xbae   : > { %v2475_v63 = vpop.eup %2474 }
 0xbaf   : > { %v2050_v9 = vmul.f32 %v2475_v63, %v2038_v41  ;;  %v2044_v4 = vmul.f32 %v2473_v57, %v2043_v62  ;;  %vm2056_vm15 = vweird.f32 %v2475_v63 }
 0xbb0   : > { %vm2057_vm2 = vmor %vm2055_vm0, %vm2056_vm15 }
 0xbb1   : > { %v2051_v0 = vmul.f32 %v2475_v63, %v2050_v9  ;;  %v2048_v7 = vsel %vm2047_vm14, %v2473_v57, %v2044_v4 }
 0xbb2   : > { %v2059_v17 = vmul.f32 %v2048_v7, %v2018_v43 }
 0xbb3   : > { %v2052_v14 = vmul.f32 0.5, %v2051_v0 }
 0xbb4   : > { %v2064_v15 = vmul.f32 %v2471_v12, %v2059_v17 }
 0xbb5   : > { %v2053_v6 = vsub.f32 1.5, %v2052_v14 }
 0xbb7   : > { %v2054_v32 = vmul.f32 %v2475_v63, %v2053_v6 }
 0xbb9   : > { %v2058_v44 = vsel %vm2057_vm2, %v2475_v63, %v2054_v32 }
 0xbba   : > { %v2060_v13 = vmul.f32 %v2058_v44, %v2019_v23 }
 0xbbc   : > { %v2065_v16 = vmul.f32 %v2471_v12, %v2060_v13 }
 0xbbe   : > { %v2070_v39 = vpack.c.bf16 %v2065_v16, %v2064_v15 }
 0xbc0   : > { %2376 = vmatmul.msk.bf16.vlgmr.msra.gmra.mxu0 %vm834_vm1, %v2070_v39 }
 0xc3d   : > { %v2085_v19 = vpop.f32.mrf.mxu0 }
 0xc3e   : > { %2091 = vst.msk [vmem:[#allocation4] sm:$0xff] %vm2090_vm3, %v2085_v19 }
 0xc45   : > { %v2087_v1 = vpop.f32.mrf.mxu0 }
 0xc46   : > { %2092 = vst.msk [vmem:[#allocation4 + $0x8] sm:$0xff] %vm2090_vm3, %v2087_v1 }
 0xc47 PF: > { %p2392_p6 = scmp.eq.s32.totalorder %s2642_s22, 1  ;;  %s2528_s6 = smov [#allocation4]  }
 0xc48   : > { %s2114_s16 = sshll.u32 %s2528_s6, 4  ;;  %s3181_s2 = sld [smem:[#allocation20_spill]]  ;;  %s2115_s16 = int_to_ptr.vmem [resolvable:$true] %s2114_s16 }
 0xc49   : > { %s2529_s20 = smov 128   ;;  %s2530_s0 = smov 8  }
 0xc4e   : > { %s2116_s23 = sshll.u32 %s3181_s2, 4  ;;  %s2117_s23 = int_to_ptr.hbm [resolvable:$true] %s2116_s23 }
 0xc4f   : > { %2389 = dma.vmem_to_hbm [thread:$0]  (%p2392_p6), %s2115_s16, 256, %s2117_s23, [#allocation5], %s2529_s20, %s2529_s20, %s2530_s0  }
 0xc50   : > { %2509 = dma.done.wait (%p2392_p6), [#allocation5], 256  }
 0xc51   : > { %2511 = vsyncadd (%p2392_p6), [#allocation5], 4294967040 }
 0xc52 PF: > { %s3182_s5 = sld [smem:[#allocation7_spill]] }
 0xc58   : > { %s32_s1 = sadd.s32 1, %s3182_s5  }
 0xc59   : > { %p29_p7 = scmp.ge.s32.totalorder %s32_s1, 4  }
 0xc5b   :  { %31 = sbr.rel (!%p29_p7) target bundleno = 14 (0xe), region = 184 }
 0xc60   :  { %2149 = vsyncpa [#allocation5], 1 }
 0xc61   :  { %2151 = vsyncpa [#allocation5 + $0x1], 1 }

</bundles_post_ra>
